<compile_context>
chip_gen: v6e
topology: v6e:2x2x1
jax: 0.10.0
libtpu: 0.0.40
codegen_flags: <defaults>
</compile_context>

<pallas_src>
import jax
import jax.numpy as jnp
from jax.experimental import pallas as pl
from jax.experimental.pallas import tpu as pltpu


def _make_encoder_kernel(B, T, H, num_layers):
    """Build the fused multi-layer LSTM kernel (single grid step, all-VMEM).

    Kernel refs (in order):
      x2d_ref:                     (T*B, D_in0)  time-major flattened input
      per layer l:  wih_t_ref      (D_in, 4H)    pre-transposed W_ih
                    whh_t_ref      (H, 4H)       pre-transposed W_hh
                    bias_ref       (1, 4H)       b_ih + b_hh
      out2d_ref:                   (T*B, H)      last-layer output (time-major)
      seq_sc:                      (T*B, H)      VMEM scratch for inter-layer acts
    """

    def kernel(*refs):
        x_ref = refs[0]
        out_ref = refs[1 + 3 * num_layers]
        seq_sc = refs[2 + 3 * num_layers]

        cur = x_ref[...].astype(jnp.float32)            # (T*B, D_in)
        for layer in range(num_layers):
            wih = refs[1 + 3 * layer][...]              # (D_in, 4H)
            whh = refs[2 + 3 * layer][...]              # (H, 4H)
            bias = refs[3 + 3 * layer][...]             # (1, 4H)

            # Hoisted input projection: the x-path has no sequential dependence,
            # so it is ONE big MXU matmul over the whole sequence (M = T*B).
            # NOTE: bf16 matmul inputs (f32 accumulation) are a further win on
            # v6e/v7x; kept f32 here for exact parity with the f32 reference.
            xg = jnp.dot(cur, wih, preferred_element_type=jnp.float32) + bias  # (T*B, 4H)

            h = jnp.zeros((B, H), jnp.float32)
            c = jnp.zeros((B, H), jnp.float32)
            dst = out_ref if layer == num_layers - 1 else seq_sc

            # Recurrence: only the h-path matmul is sequential.  T is small and
            # static, so fully unroll (straight-line code, full LLO visibility).
            for t in range(T):
                gates = xg[t * B:(t + 1) * B, :] + jnp.dot(
                    h, whh, preferred_element_type=jnp.float32)      # (B, 4H)
                # PyTorch gate order: i, f, g, o.
                # NOTE: H=32 gate slices land on 32-lane boundaries (cheap XLU
                # lane selects at this size; pad H to 128 for production sizes).
                i = jax.nn.sigmoid(gates[:, 0 * H:1 * H])
                f = jax.nn.sigmoid(gates[:, 1 * H:2 * H])
                g = jnp.tanh(gates[:, 2 * H:3 * H])
                o = jax.nn.sigmoid(gates[:, 3 * H:4 * H])
                c = f * c + i * g
                h = o * jnp.tanh(c)
                # Per-step stores go to the VMEM-resident output block; the HBM
                # writeback is a single DMA at kernel end.
                dst[t * B:(t + 1) * B, :] = h.astype(dst.dtype)

            if layer < num_layers - 1:
                # Inter-layer activation stays in VMEM (no HBM round trip).
                cur = seq_sc[...]

    return kernel


def encoder_forward_pallas(x_btd, prepared_params):
    """x_btd: (B, T, input_dim).  Returns hidden_outs: (B, T, embedding_dim)."""
    B, T, D = x_btd.shape
    H = prepared_params[0][1].shape[0]          # whh_t is (H, 4H)
    num_layers = len(prepared_params)

    # Time-major flatten so each timestep's batch rows are contiguous sublanes
    # inside the kernel (tiny XLA relayout; everything downstream is fused).
    x2d = jnp.transpose(x_btd, (1, 0, 2)).reshape(T * B, D).astype(jnp.float32)

    flat_weights = []
    for (wih_t, whh_t, bias_row) in prepared_params:
        flat_weights += [wih_t, whh_t, bias_row]

    out2d = pl.pallas_call(
        _make_encoder_kernel(B, T, H, num_layers),
        out_shape=jax.ShapeDtypeStruct((T * B, H), jnp.float32),
        scratch_shapes=[pltpu.VMEM((T * B, H), jnp.float32)],
    )(x2d, *flat_weights)

    return jnp.transpose(out2d.reshape(T, B, H), (1, 0, 2))


encoder_forward_pallas_jit = jax.jit(encoder_forward_pallas)


def init_encoder_params(key, input_dim, embedding_dim, lstm_layers):
    """Deterministic init mimicking nn.LSTM: U(-1/sqrt(H), 1/sqrt(H))."""
    H = embedding_dim
    bound = 1.0 / (H ** 0.5)
    params = []
    for layer in range(lstm_layers):
        d_in = input_dim if layer == 0 else H
        key, k1, k2, k3, k4 = jax.random.split(key, 5)
        w_ih = jax.random.uniform(k1, (4 * H, d_in), jnp.float32, -bound, bound)
        w_hh = jax.random.uniform(k2, (4 * H, H), jnp.float32, -bound, bound)
        b_ih = jax.random.uniform(k3, (4 * H,), jnp.float32, -bound, bound)
        b_hh = jax.random.uniform(k4, (4 * H,), jnp.float32, -bound, bound)
        params.append((w_ih, w_hh, b_ih, b_hh))
    return params


def prepare_encoder_params(params):
    """Pre-transpose weights / pre-sum biases ONCE, outside the jitted forward."""
    prepared = []
    for (w_ih, w_hh, b_ih, b_hh) in params:
        prepared.append((
            jnp.transpose(w_ih),          # (D_in, 4H)
            jnp.transpose(w_hh),          # (H, 4H)
            (b_ih + b_hh)[None, :],       # (1, 4H)
        ))
    return prepared


def encoder_forward_ref(x_btd, params):
    """Pure-JAX reference (lax.scan) for correctness checking."""
    x = jnp.transpose(x_btd, (1, 0, 2)).astype(jnp.float32)  # (T, B, D)
    for (w_ih, w_hh, b_ih, b_hh) in params:
        H = w_hh.shape[1]
        B = x.shape[1]

        def step(carry, x_t):
            h, c = carry
            gates = x_t @ w_ih.T + h @ w_hh.T + b_ih + b_hh
            i = jax.nn.sigmoid(gates[:, 0 * H:1 * H])
            f = jax.nn.sigmoid(gates[:, 1 * H:2 * H])
            g = jnp.tanh(gates[:, 2 * H:3 * H])
            o = jax.nn.sigmoid(gates[:, 3 * H:4 * H])
            c = f * c + i * g
            h = o * jnp.tanh(c)
            return (h, c), h

        init = (jnp.zeros((B, H), jnp.float32), jnp.zeros((B, H), jnp.float32))
        _, x = jax.lax.scan(step, init, x)
    return jnp.transpose(x, (1, 0, 2))


if __name__ == "__main__":
    # Small shapes consistent with the module: batch=2, seq=8, input_dim=16,
    # embedding_dim=32, lstm_layers=2, dropout unused in eval forward.
    B, T, INPUT_DIM, EMB_DIM, NUM_LAYERS = 2, 8, 16, 32, 2

    key = jax.random.PRNGKey(0)
    key, kx = jax.random.split(key)
    x = jax.random.normal(kx, (B, T, INPUT_DIM), jnp.float32)

    params = init_encoder_params(key, INPUT_DIM, EMB_DIM, NUM_LAYERS)
    prepared = prepare_encoder_params(params)

    out = encoder_forward_pallas_jit(x, prepared)
    out = jax.block_until_ready(out)

    ref = encoder_forward_ref(x, params)
    assert out.shape == (B, T, EMB_DIM), out.shape
    max_err = float(jnp.max(jnp.abs(out - ref)))
    assert jnp.allclose(out, ref, atol=3e-5, rtol=3e-5), max_err

    print("KERNEL_OK")
</pallas_src>

<mosaic_0001>
module attributes {stable_mosaic.version = 11 : i64} {
  func.func @kernel(%arg0: memref<16x16xf32, #tpu.memory_space<vmem>>, %arg1: memref<16x128xf32, #tpu.memory_space<vmem>>, %arg2: memref<32x128xf32, #tpu.memory_space<vmem>>, %arg3: memref<1x128xf32, #tpu.memory_space<vmem>>, %arg4: memref<32x128xf32, #tpu.memory_space<vmem>>, %arg5: memref<32x128xf32, #tpu.memory_space<vmem>>, %arg6: memref<1x128xf32, #tpu.memory_space<vmem>>, %arg7: memref<16x32xf32, #tpu.memory_space<vmem>>, %arg8: memref<16x32xf32, #tpu.memory_space<vmem>>) attributes {dimension_semantics = [], scalar_prefetch = 0 : i64, scratch_operands = 1 : i64, tpu.core_type = #tpu.core_type<tc>} {
    %c0 = arith.constant 0 : index
    %c0_0 = arith.constant 0 : index
    %0 = vector.load %arg0[%c0, %c0_0] : memref<16x16xf32, #tpu.memory_space<vmem>>, vector<16x16xf32>
    %c0_1 = arith.constant 0 : index
    %c0_2 = arith.constant 0 : index
    %1 = vector.load %arg1[%c0_1, %c0_2] : memref<16x128xf32, #tpu.memory_space<vmem>>, vector<16x128xf32>
    %c0_3 = arith.constant 0 : index
    %c0_4 = arith.constant 0 : index
    %2 = vector.load %arg2[%c0_3, %c0_4] : memref<32x128xf32, #tpu.memory_space<vmem>>, vector<32x128xf32>
    %c0_5 = arith.constant 0 : index
    %c0_6 = arith.constant 0 : index
    %3 = vector.load %arg3[%c0_5, %c0_6] : memref<1x128xf32, #tpu.memory_space<vmem>>, vector<1x128xf32>
    %cst = arith.constant dense<0.000000e+00> : vector<16x128xf32>
    %4 = tpu.matmul %0, %1, %cst {dimension_numbers = #tpu.dot_dimension_numbers<[1], [0], [0], [1], [0, 0, 1, 1], [], []>} : vector<16x16xf32>, vector<16x128xf32>, vector<16x128xf32> -> vector<16x128xf32>
    %5 = vector.broadcast %3 : vector<1x128xf32> to vector<16x128xf32>
    %6 = arith.addf %4, %5 : vector<16x128xf32>
    %cst_7 = arith.constant 0.000000e+00 : f32
    %7 = vector.broadcast %cst_7 : f32 to vector<2x32xf32>
    %cst_8 = arith.constant 0.000000e+00 : f32
    %8 = vector.broadcast %cst_8 : f32 to vector<2x32xf32>
    %9 = vector.extract_strided_slice %6 {offsets = [0, 0], sizes = [2, 128], strides = [1, 1]} : vector<16x128xf32> to vector<2x128xf32>
    %cst_9 = arith.constant dense<0.000000e+00> : vector<2x128xf32>
    %10 = tpu.matmul %7, %2, %cst_9 {dimension_numbers = #tpu.dot_dimension_numbers<[1], [0], [0], [1], [0, 0, 1, 1], [], []>} : vector<2x32xf32>, vector<32x128xf32>, vector<2x128xf32> -> vector<2x128xf32>
    %11 = arith.addf %9, %10 : vector<2x128xf32>
    %12 = vector.extract_strided_slice %11 {offsets = [0, 0], sizes = [2, 32], strides = [1, 1]} : vector<2x128xf32> to vector<2x32xf32>
    %13 = arith.negf %12 : vector<2x32xf32>
    %14 = math.exp %13 : vector<2x32xf32>
    %cst_10 = arith.constant 1.000000e+00 : f32
    %15 = vector.broadcast %cst_10 : f32 to vector<2x32xf32>
    %16 = arith.addf %15, %14 : vector<2x32xf32>
    %17 = arith.divf %15, %16 : vector<2x32xf32>
    %18 = vector.extract_strided_slice %11 {offsets = [0, 32], sizes = [2, 32], strides = [1, 1]} : vector<2x128xf32> to vector<2x32xf32>
    %19 = arith.negf %18 : vector<2x32xf32>
    %20 = math.exp %19 : vector<2x32xf32>
    %cst_11 = arith.constant 1.000000e+00 : f32
    %21 = vector.broadcast %cst_11 : f32 to vector<2x32xf32>
    %22 = arith.addf %21, %20 : vector<2x32xf32>
    %23 = arith.divf %21, %22 : vector<2x32xf32>
    %24 = vector.extract_strided_slice %11 {offsets = [0, 64], sizes = [2, 32], strides = [1, 1]} : vector<2x128xf32> to vector<2x32xf32>
    %25 = math.tanh %24 : vector<2x32xf32>
    %26 = vector.extract_strided_slice %11 {offsets = [0, 96], sizes = [2, 32], strides = [1, 1]} : vector<2x128xf32> to vector<2x32xf32>
    %27 = arith.negf %26 : vector<2x32xf32>
    %28 = math.exp %27 : vector<2x32xf32>
    %cst_12 = arith.constant 1.000000e+00 : f32
    %29 = vector.broadcast %cst_12 : f32 to vector<2x32xf32>
    %30 = arith.addf %29, %28 : vector<2x32xf32>
    %31 = arith.divf %29, %30 : vector<2x32xf32>
    %32 = arith.mulf %23, %8 : vector<2x32xf32>
    %33 = arith.mulf %17, %25 : vector<2x32xf32>
    %34 = arith.addf %32, %33 : vector<2x32xf32>
    %35 = math.tanh %34 : vector<2x32xf32>
    %36 = arith.mulf %31, %35 : vector<2x32xf32>
    %c0_13 = arith.constant 0 : index
    %c0_14 = arith.constant 0 : index
    %37 = vector.load %arg8[%c0_13, %c0_14] : memref<16x32xf32, #tpu.memory_space<vmem>>, vector<2x32xf32>
    tpu.vector_store %arg8[%c0_13, %c0_14], %36 {strides = array<i32>} : memref<16x32xf32, #tpu.memory_space<vmem>>, vector<2x32xf32>,
    %38 = vector.extract_strided_slice %6 {offsets = [2, 0], sizes = [2, 128], strides = [1, 1]} : vector<16x128xf32> to vector<2x128xf32>
    %cst_15 = arith.constant dense<0.000000e+00> : vector<2x128xf32>
    %39 = tpu.matmul %36, %2, %cst_15 {dimension_numbers = #tpu.dot_dimension_numbers<[1], [0], [0], [1], [0, 0, 1, 1], [], []>} : vector<2x32xf32>, vector<32x128xf32>, vector<2x128xf32> -> vector<2x128xf32>
    %40 = arith.addf %38, %39 : vector<2x128xf32>
    %41 = vector.extract_strided_slice %40 {offsets = [0, 0], sizes = [2, 32], strides = [1, 1]} : vector<2x128xf32> to vector<2x32xf32>
    %42 = arith.negf %41 : vector<2x32xf32>
    %43 = math.exp %42 : vector<2x32xf32>
    %cst_16 = arith.constant 1.000000e+00 : f32
    %44 = vector.broadcast %cst_16 : f32 to vector<2x32xf32>
    %45 = arith.addf %44, %43 : vector<2x32xf32>
    %46 = arith.divf %44, %45 : vector<2x32xf32>
    %47 = vector.extract_strided_slice %40 {offsets = [0, 32], sizes = [2, 32], strides = [1, 1]} : vector<2x128xf32> to vector<2x32xf32>
    %48 = arith.negf %47 : vector<2x32xf32>
    %49 = math.exp %48 : vector<2x32xf32>
    %cst_17 = arith.constant 1.000000e+00 : f32
    %50 = vector.broadcast %cst_17 : f32 to vector<2x32xf32>
    %51 = arith.addf %50, %49 : vector<2x32xf32>
    %52 = arith.divf %50, %51 : vector<2x32xf32>
    %53 = vector.extract_strided_slice %40 {offsets = [0, 64], sizes = [2, 32], strides = [1, 1]} : vector<2x128xf32> to vector<2x32xf32>
    %54 = math.tanh %53 : vector<2x32xf32>
    %55 = vector.extract_strided_slice %40 {offsets = [0, 96], sizes = [2, 32], strides = [1, 1]} : vector<2x128xf32> to vector<2x32xf32>
    %56 = arith.negf %55 : vector<2x32xf32>
    %57 = math.exp %56 : vector<2x32xf32>
    %cst_18 = arith.constant 1.000000e+00 : f32
    %58 = vector.broadcast %cst_18 : f32 to vector<2x32xf32>
    %59 = arith.addf %58, %57 : vector<2x32xf32>
    %60 = arith.divf %58, %59 : vector<2x32xf32>
    %61 = arith.mulf %52, %34 : vector<2x32xf32>
    %62 = arith.mulf %46, %54 : vector<2x32xf32>
    %63 = arith.addf %61, %62 : vector<2x32xf32>
    %64 = math.tanh %63 : vector<2x32xf32>
    %65 = arith.mulf %60, %64 : vector<2x32xf32>
    %c2 = arith.constant 2 : index
    %c0_19 = arith.constant 0 : index
    %66 = vector.load %arg8[%c2, %c0_19] : memref<16x32xf32, #tpu.memory_space<vmem>>, vector<2x32xf32>
    tpu.vector_store %arg8[%c2, %c0_19], %65 {strides = array<i32>} : memref<16x32xf32, #tpu.memory_space<vmem>>, vector<2x32xf32>,
    %67 = vector.extract_strided_slice %6 {offsets = [4, 0], sizes = [2, 128], strides = [1, 1]} : vector<16x128xf32> to vector<2x128xf32>
    %cst_20 = arith.constant dense<0.000000e+00> : vector<2x128xf32>
    %68 = tpu.matmul %65, %2, %cst_20 {dimension_numbers = #tpu.dot_dimension_numbers<[1], [0], [0], [1], [0, 0, 1, 1], [], []>} : vector<2x32xf32>, vector<32x128xf32>, vector<2x128xf32> -> vector<2x128xf32>
    %69 = arith.addf %67, %68 : vector<2x128xf32>
    %70 = vector.extract_strided_slice %69 {offsets = [0, 0], sizes = [2, 32], strides = [1, 1]} : vector<2x128xf32> to vector<2x32xf32>
    %71 = arith.negf %70 : vector<2x32xf32>
    %72 = math.exp %71 : vector<2x32xf32>
    %cst_21 = arith.constant 1.000000e+00 : f32
    %73 = vector.broadcast %cst_21 : f32 to vector<2x32xf32>
    %74 = arith.addf %73, %72 : vector<2x32xf32>
    %75 = arith.divf %73, %74 : vector<2x32xf32>
    %76 = vector.extract_strided_slice %69 {offsets = [0, 32], sizes = [2, 32], strides = [1, 1]} : vector<2x128xf32> to vector<2x32xf32>
    %77 = arith.negf %76 : vector<2x32xf32>
    %78 = math.exp %77 : vector<2x32xf32>
    %cst_22 = arith.constant 1.000000e+00 : f32
    %79 = vector.broadcast %cst_22 : f32 to vector<2x32xf32>
    %80 = arith.addf %79, %78 : vector<2x32xf32>
    %81 = arith.divf %79, %80 : vector<2x32xf32>
    %82 = vector.extract_strided_slice %69 {offsets = [0, 64], sizes = [2, 32], strides = [1, 1]} : vector<2x128xf32> to vector<2x32xf32>
    %83 = math.tanh %82 : vector<2x32xf32>
    %84 = vector.extract_strided_slice %69 {offsets = [0, 96], sizes = [2, 32], strides = [1, 1]} : vector<2x128xf32> to vector<2x32xf32>
    %85 = arith.negf %84 : vector<2x32xf32>
    %86 = math.exp %85 : vector<2x32xf32>
    %cst_23 = arith.constant 1.000000e+00 : f32
    %87 = vector.broadcast %cst_23 : f32 to vector<2x32xf32>
    %88 = arith.addf %87, %86 : vector<2x32xf32>
    %89 = arith.divf %87, %88 : vector<2x32xf32>
    %90 = arith.mulf %81, %63 : vector<2x32xf32>
    %91 = arith.mulf %75, %83 : vector<2x32xf32>
    %92 = arith.addf %90, %91 : vector<2x32xf32>
    %93 = math.tanh %92 : vector<2x32xf32>
    %94 = arith.mulf %89, %93 : vector<2x32xf32>
    %c4 = arith.constant 4 : index
    %c0_24 = arith.constant 0 : index
    %95 = vector.load %arg8[%c4, %c0_24] : memref<16x32xf32, #tpu.memory_space<vmem>>, vector<2x32xf32>
    tpu.vector_store %arg8[%c4, %c0_24], %94 {strides = array<i32>} : memref<16x32xf32, #tpu.memory_space<vmem>>, vector<2x32xf32>,
    %96 = vector.extract_strided_slice %6 {offsets = [6, 0], sizes = [2, 128], strides = [1, 1]} : vector<16x128xf32> to vector<2x128xf32>
    %cst_25 = arith.constant dense<0.000000e+00> : vector<2x128xf32>
    %97 = tpu.matmul %94, %2, %cst_25 {dimension_numbers = #tpu.dot_dimension_numbers<[1], [0], [0], [1], [0, 0, 1, 1], [], []>} : vector<2x32xf32>, vector<32x128xf32>, vector<2x128xf32> -> vector<2x128xf32>
    %98 = arith.addf %96, %97 : vector<2x128xf32>
    %99 = vector.extract_strided_slice %98 {offsets = [0, 0], sizes = [2, 32], strides = [1, 1]} : vector<2x128xf32> to vector<2x32xf32>
    %100 = arith.negf %99 : vector<2x32xf32>
    %101 = math.exp %100 : vector<2x32xf32>
    %cst_26 = arith.constant 1.000000e+00 : f32
    %102 = vector.broadcast %cst_26 : f32 to vector<2x32xf32>
    %103 = arith.addf %102, %101 : vector<2x32xf32>
    %104 = arith.divf %102, %103 : vector<2x32xf32>
    %105 = vector.extract_strided_slice %98 {offsets = [0, 32], sizes = [2, 32], strides = [1, 1]} : vector<2x128xf32> to vector<2x32xf32>
    %106 = arith.negf %105 : vector<2x32xf32>
    %107 = math.exp %106 : vector<2x32xf32>
    %cst_27 = arith.constant 1.000000e+00 : f32
    %108 = vector.broadcast %cst_27 : f32 to vector<2x32xf32>
    %109 = arith.addf %108, %107 : vector<2x32xf32>
    %110 = arith.divf %108, %109 : vector<2x32xf32>
    %111 = vector.extract_strided_slice %98 {offsets = [0, 64], sizes = [2, 32], strides = [1, 1]} : vector<2x128xf32> to vector<2x32xf32>
    %112 = math.tanh %111 : vector<2x32xf32>
    %113 = vector.extract_strided_slice %98 {offsets = [0, 96], sizes = [2, 32], strides = [1, 1]} : vector<2x128xf32> to vector<2x32xf32>
    %114 = arith.negf %113 : vector<2x32xf32>
    %115 = math.exp %114 : vector<2x32xf32>
    %cst_28 = arith.constant 1.000000e+00 : f32
    %116 = vector.broadcast %cst_28 : f32 to vector<2x32xf32>
    %117 = arith.addf %116, %115 : vector<2x32xf32>
    %118 = arith.divf %116, %117 : vector<2x32xf32>
    %119 = arith.mulf %110, %92 : vector<2x32xf32>
    %120 = arith.mulf %104, %112 : vector<2x32xf32>
    %121 = arith.addf %119, %120 : vector<2x32xf32>
    %122 = math.tanh %121 : vector<2x32xf32>
    %123 = arith.mulf %118, %122 : vector<2x32xf32>
    %c6 = arith.constant 6 : index
    %c0_29 = arith.constant 0 : index
    %124 = vector.load %arg8[%c6, %c0_29] : memref<16x32xf32, #tpu.memory_space<vmem>>, vector<2x32xf32>
    tpu.vector_store %arg8[%c6, %c0_29], %123 {strides = array<i32>} : memref<16x32xf32, #tpu.memory_space<vmem>>, vector<2x32xf32>,
    %125 = vector.extract_strided_slice %6 {offsets = [8, 0], sizes = [2, 128], strides = [1, 1]} : vector<16x128xf32> to vector<2x128xf32>
    %cst_30 = arith.constant dense<0.000000e+00> : vector<2x128xf32>
    %126 = tpu.matmul %123, %2, %cst_30 {dimension_numbers = #tpu.dot_dimension_numbers<[1], [0], [0], [1], [0, 0, 1, 1], [], []>} : vector<2x32xf32>, vector<32x128xf32>, vector<2x128xf32> -> vector<2x128xf32>
    %127 = arith.addf %125, %126 : vector<2x128xf32>
    %128 = vector.extract_strided_slice %127 {offsets = [0, 0], sizes = [2, 32], strides = [1, 1]} : vector<2x128xf32> to vector<2x32xf32>
    %129 = arith.negf %128 : vector<2x32xf32>
    %130 = math.exp %129 : vector<2x32xf32>
    %cst_31 = arith.constant 1.000000e+00 : f32
    %131 = vector.broadcast %cst_31 : f32 to vector<2x32xf32>
    %132 = arith.addf %131, %130 : vector<2x32xf32>
    %133 = arith.divf %131, %132 : vector<2x32xf32>
    %134 = vector.extract_strided_slice %127 {offsets = [0, 32], sizes = [2, 32], strides = [1, 1]} : vector<2x128xf32> to vector<2x32xf32>
    %135 = arith.negf %134 : vector<2x32xf32>
    %136 = math.exp %135 : vector<2x32xf32>
    %cst_32 = arith.constant 1.000000e+00 : f32
    %137 = vector.broadcast %cst_32 : f32 to vector<2x32xf32>
    %138 = arith.addf %137, %136 : vector<2x32xf32>
    %139 = arith.divf %137, %138 : vector<2x32xf32>
    %140 = vector.extract_strided_slice %127 {offsets = [0, 64], sizes = [2, 32], strides = [1, 1]} : vector<2x128xf32> to vector<2x32xf32>
    %141 = math.tanh %140 : vector<2x32xf32>
    %142 = vector.extract_strided_slice %127 {offsets = [0, 96], sizes = [2, 32], strides = [1, 1]} : vector<2x128xf32> to vector<2x32xf32>
    %143 = arith.negf %142 : vector<2x32xf32>
    %144 = math.exp %143 : vector<2x32xf32>
    %cst_33 = arith.constant 1.000000e+00 : f32
    %145 = vector.broadcast %cst_33 : f32 to vector<2x32xf32>
    %146 = arith.addf %145, %144 : vector<2x32xf32>
    %147 = arith.divf %145, %146 : vector<2x32xf32>
    %148 = arith.mulf %139, %121 : vector<2x32xf32>
    %149 = arith.mulf %133, %141 : vector<2x32xf32>
    %150 = arith.addf %148, %149 : vector<2x32xf32>
    %151 = math.tanh %150 : vector<2x32xf32>
    %152 = arith.mulf %147, %151 : vector<2x32xf32>
    %c8 = arith.constant 8 : index
    %c0_34 = arith.constant 0 : index
    %153 = vector.load %arg8[%c8, %c0_34] : memref<16x32xf32, #tpu.memory_space<vmem>>, vector<2x32xf32>
    tpu.vector_store %arg8[%c8, %c0_34], %152 {strides = array<i32>} : memref<16x32xf32, #tpu.memory_space<vmem>>, vector<2x32xf32>,
    %154 = vector.extract_strided_slice %6 {offsets = [10, 0], sizes = [2, 128], strides = [1, 1]} : vector<16x128xf32> to vector<2x128xf32>
    %cst_35 = arith.constant dense<0.000000e+00> : vector<2x128xf32>
    %155 = tpu.matmul %152, %2, %cst_35 {dimension_numbers = #tpu.dot_dimension_numbers<[1], [0], [0], [1], [0, 0, 1, 1], [], []>} : vector<2x32xf32>, vector<32x128xf32>, vector<2x128xf32> -> vector<2x128xf32>
    %156 = arith.addf %154, %155 : vector<2x128xf32>
    %157 = vector.extract_strided_slice %156 {offsets = [0, 0], sizes = [2, 32], strides = [1, 1]} : vector<2x128xf32> to vector<2x32xf32>
    %158 = arith.negf %157 : vector<2x32xf32>
    %159 = math.exp %158 : vector<2x32xf32>
    %cst_36 = arith.constant 1.000000e+00 : f32
    %160 = vector.broadcast %cst_36 : f32 to vector<2x32xf32>
    %161 = arith.addf %160, %159 : vector<2x32xf32>
    %162 = arith.divf %160, %161 : vector<2x32xf32>
    %163 = vector.extract_strided_slice %156 {offsets = [0, 32], sizes = [2, 32], strides = [1, 1]} : vector<2x128xf32> to vector<2x32xf32>
    %164 = arith.negf %163 : vector<2x32xf32>
    %165 = math.exp %164 : vector<2x32xf32>
    %cst_37 = arith.constant 1.000000e+00 : f32
    %166 = vector.broadcast %cst_37 : f32 to vector<2x32xf32>
    %167 = arith.addf %166, %165 : vector<2x32xf32>
    %168 = arith.divf %166, %167 : vector<2x32xf32>
    %169 = vector.extract_strided_slice %156 {offsets = [0, 64], sizes = [2, 32], strides = [1, 1]} : vector<2x128xf32> to vector<2x32xf32>
    %170 = math.tanh %169 : vector<2x32xf32>
    %171 = vector.extract_strided_slice %156 {offsets = [0, 96], sizes = [2, 32], strides = [1, 1]} : vector<2x128xf32> to vector<2x32xf32>
    %172 = arith.negf %171 : vector<2x32xf32>
    %173 = math.exp %172 : vector<2x32xf32>
    %cst_38 = arith.constant 1.000000e+00 : f32
    %174 = vector.broadcast %cst_38 : f32 to vector<2x32xf32>
    %175 = arith.addf %174, %173 : vector<2x32xf32>
    %176 = arith.divf %174, %175 : vector<2x32xf32>
    %177 = arith.mulf %168, %150 : vector<2x32xf32>
    %178 = arith.mulf %162, %170 : vector<2x32xf32>
    %179 = arith.addf %177, %178 : vector<2x32xf32>
    %180 = math.tanh %179 : vector<2x32xf32>
    %181 = arith.mulf %176, %180 : vector<2x32xf32>
    %c10 = arith.constant 10 : index
    %c0_39 = arith.constant 0 : index
    %182 = vector.load %arg8[%c10, %c0_39] : memref<16x32xf32, #tpu.memory_space<vmem>>, vector<2x32xf32>
    tpu.vector_store %arg8[%c10, %c0_39], %181 {strides = array<i32>} : memref<16x32xf32, #tpu.memory_space<vmem>>, vector<2x32xf32>,
    %183 = vector.extract_strided_slice %6 {offsets = [12, 0], sizes = [2, 128], strides = [1, 1]} : vector<16x128xf32> to vector<2x128xf32>
    %cst_40 = arith.constant dense<0.000000e+00> : vector<2x128xf32>
    %184 = tpu.matmul %181, %2, %cst_40 {dimension_numbers = #tpu.dot_dimension_numbers<[1], [0], [0], [1], [0, 0, 1, 1], [], []>} : vector<2x32xf32>, vector<32x128xf32>, vector<2x128xf32> -> vector<2x128xf32>
    %185 = arith.addf %183, %184 : vector<2x128xf32>
    %186 = vector.extract_strided_slice %185 {offsets = [0, 0], sizes = [2, 32], strides = [1, 1]} : vector<2x128xf32> to vector<2x32xf32>
    %187 = arith.negf %186 : vector<2x32xf32>
    %188 = math.exp %187 : vector<2x32xf32>
    %cst_41 = arith.constant 1.000000e+00 : f32
    %189 = vector.broadcast %cst_41 : f32 to vector<2x32xf32>
    %190 = arith.addf %189, %188 : vector<2x32xf32>
    %191 = arith.divf %189, %190 : vector<2x32xf32>
    %192 = vector.extract_strided_slice %185 {offsets = [0, 32], sizes = [2, 32], strides = [1, 1]} : vector<2x128xf32> to vector<2x32xf32>
    %193 = arith.negf %192 : vector<2x32xf32>
    %194 = math.exp %193 : vector<2x32xf32>
    %cst_42 = arith.constant 1.000000e+00 : f32
    %195 = vector.broadcast %cst_42 : f32 to vector<2x32xf32>
    %196 = arith.addf %195, %194 : vector<2x32xf32>
    %197 = arith.divf %195, %196 : vector<2x32xf32>
    %198 = vector.extract_strided_slice %185 {offsets = [0, 64], sizes = [2, 32], strides = [1, 1]} : vector<2x128xf32> to vector<2x32xf32>
    %199 = math.tanh %198 : vector<2x32xf32>
    %200 = vector.extract_strided_slice %185 {offsets = [0, 96], sizes = [2, 32], strides = [1, 1]} : vector<2x128xf32> to vector<2x32xf32>
    %201 = arith.negf %200 : vector<2x32xf32>
    %202 = math.exp %201 : vector<2x32xf32>
    %cst_43 = arith.constant 1.000000e+00 : f32
    %203 = vector.broadcast %cst_43 : f32 to vector<2x32xf32>
    %204 = arith.addf %203, %202 : vector<2x32xf32>
    %205 = arith.divf %203, %204 : vector<2x32xf32>
    %206 = arith.mulf %197, %179 : vector<2x32xf32>
    %207 = arith.mulf %191, %199 : vector<2x32xf32>
    %208 = arith.addf %206, %207 : vector<2x32xf32>
    %209 = math.tanh %208 : vector<2x32xf32>
    %210 = arith.mulf %205, %209 : vector<2x32xf32>
    %c12 = arith.constant 12 : index
    %c0_44 = arith.constant 0 : index
    %211 = vector.load %arg8[%c12, %c0_44] : memref<16x32xf32, #tpu.memory_space<vmem>>, vector<2x32xf32>
    tpu.vector_store %arg8[%c12, %c0_44], %210 {strides = array<i32>} : memref<16x32xf32, #tpu.memory_space<vmem>>, vector<2x32xf32>,
    %212 = vector.extract_strided_slice %6 {offsets = [14, 0], sizes = [2, 128], strides = [1, 1]} : vector<16x128xf32> to vector<2x128xf32>
    %cst_45 = arith.constant dense<0.000000e+00> : vector<2x128xf32>
    %213 = tpu.matmul %210, %2, %cst_45 {dimension_numbers = #tpu.dot_dimension_numbers<[1], [0], [0], [1], [0, 0, 1, 1], [], []>} : vector<2x32xf32>, vector<32x128xf32>, vector<2x128xf32> -> vector<2x128xf32>
    %214 = arith.addf %212, %213 : vector<2x128xf32>
    %215 = vector.extract_strided_slice %214 {offsets = [0, 0], sizes = [2, 32], strides = [1, 1]} : vector<2x128xf32> to vector<2x32xf32>
    %216 = arith.negf %215 : vector<2x32xf32>
    %217 = math.exp %216 : vector<2x32xf32>
    %cst_46 = arith.constant 1.000000e+00 : f32
    %218 = vector.broadcast %cst_46 : f32 to vector<2x32xf32>
    %219 = arith.addf %218, %217 : vector<2x32xf32>
    %220 = arith.divf %218, %219 : vector<2x32xf32>
    %221 = vector.extract_strided_slice %214 {offsets = [0, 32], sizes = [2, 32], strides = [1, 1]} : vector<2x128xf32> to vector<2x32xf32>
    %222 = arith.negf %221 : vector<2x32xf32>
    %223 = math.exp %222 : vector<2x32xf32>
    %cst_47 = arith.constant 1.000000e+00 : f32
    %224 = vector.broadcast %cst_47 : f32 to vector<2x32xf32>
    %225 = arith.addf %224, %223 : vector<2x32xf32>
    %226 = arith.divf %224, %225 : vector<2x32xf32>
    %227 = vector.extract_strided_slice %214 {offsets = [0, 64], sizes = [2, 32], strides = [1, 1]} : vector<2x128xf32> to vector<2x32xf32>
    %228 = math.tanh %227 : vector<2x32xf32>
    %229 = vector.extract_strided_slice %214 {offsets = [0, 96], sizes = [2, 32], strides = [1, 1]} : vector<2x128xf32> to vector<2x32xf32>
    %230 = arith.negf %229 : vector<2x32xf32>
    %231 = math.exp %230 : vector<2x32xf32>
    %cst_48 = arith.constant 1.000000e+00 : f32
    %232 = vector.broadcast %cst_48 : f32 to vector<2x32xf32>
    %233 = arith.addf %232, %231 : vector<2x32xf32>
    %234 = arith.divf %232, %233 : vector<2x32xf32>
    %235 = arith.mulf %226, %208 : vector<2x32xf32>
    %236 = arith.mulf %220, %228 : vector<2x32xf32>
    %237 = arith.addf %235, %236 : vector<2x32xf32>
    %238 = math.tanh %237 : vector<2x32xf32>
    %239 = arith.mulf %234, %238 : vector<2x32xf32>
    %c14 = arith.constant 14 : index
    %c0_49 = arith.constant 0 : index
    %240 = vector.load %arg8[%c14, %c0_49] : memref<16x32xf32, #tpu.memory_space<vmem>>, vector<2x32xf32>
    tpu.vector_store %arg8[%c14, %c0_49], %239 {strides = array<i32>} : memref<16x32xf32, #tpu.memory_space<vmem>>, vector<2x32xf32>,
    %c0_50 = arith.constant 0 : index
    %c0_51 = arith.constant 0 : index
    %241 = vector.load %arg8[%c0_50, %c0_51] : memref<16x32xf32, #tpu.memory_space<vmem>>, vector<16x32xf32>
    %c0_52 = arith.constant 0 : index
    %c0_53 = arith.constant 0 : index
    %242 = vector.load %arg4[%c0_52, %c0_53] : memref<32x128xf32, #tpu.memory_space<vmem>>, vector<32x128xf32>
    %c0_54 = arith.constant 0 : index
    %c0_55 = arith.constant 0 : index
    %243 = vector.load %arg5[%c0_54, %c0_55] : memref<32x128xf32, #tpu.memory_space<vmem>>, vector<32x128xf32>
    %c0_56 = arith.constant 0 : index
    %c0_57 = arith.constant 0 : index
    %244 = vector.load %arg6[%c0_56, %c0_57] : memref<1x128xf32, #tpu.memory_space<vmem>>, vector<1x128xf32>
    %cst_58 = arith.constant dense<0.000000e+00> : vector<16x128xf32>
    %245 = tpu.matmul %241, %242, %cst_58 {dimension_numbers = #tpu.dot_dimension_numbers<[1], [0], [0], [1], [0, 0, 1, 1], [], []>} : vector<16x32xf32>, vector<32x128xf32>, vector<16x128xf32> -> vector<16x128xf32>
    %246 = vector.broadcast %244 : vector<1x128xf32> to vector<16x128xf32>
    %247 = arith.addf %245, %246 : vector<16x128xf32>
    %cst_59 = arith.constant 0.000000e+00 : f32
    %248 = vector.broadcast %cst_59 : f32 to vector<2x32xf32>
    %cst_60 = arith.constant 0.000000e+00 : f32
    %249 = vector.broadcast %cst_60 : f32 to vector<2x32xf32>
    %250 = vector.extract_strided_slice %247 {offsets = [0, 0], sizes = [2, 128], strides = [1, 1]} : vector<16x128xf32> to vector<2x128xf32>
    %cst_61 = arith.constant dense<0.000000e+00> : vector<2x128xf32>
    %251 = tpu.matmul %248, %243, %cst_61 {dimension_numbers = #tpu.dot_dimension_numbers<[1], [0], [0], [1], [0, 0, 1, 1], [], []>} : vector<2x32xf32>, vector<32x128xf32>, vector<2x128xf32> -> vector<2x128xf32>
    %252 = arith.addf %250, %251 : vector<2x128xf32>
    %253 = vector.extract_strided_slice %252 {offsets = [0, 0], sizes = [2, 32], strides = [1, 1]} : vector<2x128xf32> to vector<2x32xf32>
    %254 = arith.negf %253 : vector<2x32xf32>
    %255 = math.exp %254 : vector<2x32xf32>
    %cst_62 = arith.constant 1.000000e+00 : f32
    %256 = vector.broadcast %cst_62 : f32 to vector<2x32xf32>
    %257 = arith.addf %256, %255 : vector<2x32xf32>
    %258 = arith.divf %256, %257 : vector<2x32xf32>
    %259 = vector.extract_strided_slice %252 {offsets = [0, 32], sizes = [2, 32], strides = [1, 1]} : vector<2x128xf32> to vector<2x32xf32>
    %260 = arith.negf %259 : vector<2x32xf32>
    %261 = math.exp %260 : vector<2x32xf32>
    %cst_63 = arith.constant 1.000000e+00 : f32
    %262 = vector.broadcast %cst_63 : f32 to vector<2x32xf32>
    %263 = arith.addf %262, %261 : vector<2x32xf32>
    %264 = arith.divf %262, %263 : vector<2x32xf32>
    %265 = vector.extract_strided_slice %252 {offsets = [0, 64], sizes = [2, 32], strides = [1, 1]} : vector<2x128xf32> to vector<2x32xf32>
    %266 = math.tanh %265 : vector<2x32xf32>
    %267 = vector.extract_strided_slice %252 {offsets = [0, 96], sizes = [2, 32], strides = [1, 1]} : vector<2x128xf32> to vector<2x32xf32>
    %268 = arith.negf %267 : vector<2x32xf32>
    %269 = math.exp %268 : vector<2x32xf32>
    %cst_64 = arith.constant 1.000000e+00 : f32
    %270 = vector.broadcast %cst_64 : f32 to vector<2x32xf32>
    %271 = arith.addf %270, %269 : vector<2x32xf32>
    %272 = arith.divf %270, %271 : vector<2x32xf32>
    %273 = arith.mulf %264, %249 : vector<2x32xf32>
    %274 = arith.mulf %258, %266 : vector<2x32xf32>
    %275 = arith.addf %273, %274 : vector<2x32xf32>
    %276 = math.tanh %275 : vector<2x32xf32>
    %277 = arith.mulf %272, %276 : vector<2x32xf32>
    %c0_65 = arith.constant 0 : index
    %c0_66 = arith.constant 0 : index
    %278 = vector.load %arg7[%c0_65, %c0_66] : memref<16x32xf32, #tpu.memory_space<vmem>>, vector<2x32xf32>
    tpu.vector_store %arg7[%c0_65, %c0_66], %277 {strides = array<i32>} : memref<16x32xf32, #tpu.memory_space<vmem>>, vector<2x32xf32>,
    %279 = vector.extract_strided_slice %247 {offsets = [2, 0], sizes = [2, 128], strides = [1, 1]} : vector<16x128xf32> to vector<2x128xf32>
    %cst_67 = arith.constant dense<0.000000e+00> : vector<2x128xf32>
    %280 = tpu.matmul %277, %243, %cst_67 {dimension_numbers = #tpu.dot_dimension_numbers<[1], [0], [0], [1], [0, 0, 1, 1], [], []>} : vector<2x32xf32>, vector<32x128xf32>, vector<2x128xf32> -> vector<2x128xf32>
    %281 = arith.addf %279, %280 : vector<2x128xf32>
    %282 = vector.extract_strided_slice %281 {offsets = [0, 0], sizes = [2, 32], strides = [1, 1]} : vector<2x128xf32> to vector<2x32xf32>
    %283 = arith.negf %282 : vector<2x32xf32>
    %284 = math.exp %283 : vector<2x32xf32>
    %cst_68 = arith.constant 1.000000e+00 : f32
    %285 = vector.broadcast %cst_68 : f32 to vector<2x32xf32>
    %286 = arith.addf %285, %284 : vector<2x32xf32>
    %287 = arith.divf %285, %286 : vector<2x32xf32>
    %288 = vector.extract_strided_slice %281 {offsets = [0, 32], sizes = [2, 32], strides = [1, 1]} : vector<2x128xf32> to vector<2x32xf32>
    %289 = arith.negf %288 : vector<2x32xf32>
    %290 = math.exp %289 : vector<2x32xf32>
    %cst_69 = arith.constant 1.000000e+00 : f32
    %291 = vector.broadcast %cst_69 : f32 to vector<2x32xf32>
    %292 = arith.addf %291, %290 : vector<2x32xf32>
    %293 = arith.divf %291, %292 : vector<2x32xf32>
    %294 = vector.extract_strided_slice %281 {offsets = [0, 64], sizes = [2, 32], strides = [1, 1]} : vector<2x128xf32> to vector<2x32xf32>
    %295 = math.tanh %294 : vector<2x32xf32>
    %296 = vector.extract_strided_slice %281 {offsets = [0, 96], sizes = [2, 32], strides = [1, 1]} : vector<2x128xf32> to vector<2x32xf32>
    %297 = arith.negf %296 : vector<2x32xf32>
    %298 = math.exp %297 : vector<2x32xf32>
    %cst_70 = arith.constant 1.000000e+00 : f32
    %299 = vector.broadcast %cst_70 : f32 to vector<2x32xf32>
    %300 = arith.addf %299, %298 : vector<2x32xf32>
    %301 = arith.divf %299, %300 : vector<2x32xf32>
    %302 = arith.mulf %293, %275 : vector<2x32xf32>
    %303 = arith.mulf %287, %295 : vector<2x32xf32>
    %304 = arith.addf %302, %303 : vector<2x32xf32>
    %305 = math.tanh %304 : vector<2x32xf32>
    %306 = arith.mulf %301, %305 : vector<2x32xf32>
    %c2_71 = arith.constant 2 : index
    %c0_72 = arith.constant 0 : index
    %307 = vector.load %arg7[%c2_71, %c0_72] : memref<16x32xf32, #tpu.memory_space<vmem>>, vector<2x32xf32>
    tpu.vector_store %arg7[%c2_71, %c0_72], %306 {strides = array<i32>} : memref<16x32xf32, #tpu.memory_space<vmem>>, vector<2x32xf32>,
    %308 = vector.extract_strided_slice %247 {offsets = [4, 0], sizes = [2, 128], strides = [1, 1]} : vector<16x128xf32> to vector<2x128xf32>
    %cst_73 = arith.constant dense<0.000000e+00> : vector<2x128xf32>
    %309 = tpu.matmul %306, %243, %cst_73 {dimension_numbers = #tpu.dot_dimension_numbers<[1], [0], [0], [1], [0, 0, 1, 1], [], []>} : vector<2x32xf32>, vector<32x128xf32>, vector<2x128xf32> -> vector<2x128xf32>
    %310 = arith.addf %308, %309 : vector<2x128xf32>
    %311 = vector.extract_strided_slice %310 {offsets = [0, 0], sizes = [2, 32], strides = [1, 1]} : vector<2x128xf32> to vector<2x32xf32>
    %312 = arith.negf %311 : vector<2x32xf32>
    %313 = math.exp %312 : vector<2x32xf32>
    %cst_74 = arith.constant 1.000000e+00 : f32
    %314 = vector.broadcast %cst_74 : f32 to vector<2x32xf32>
    %315 = arith.addf %314, %313 : vector<2x32xf32>
    %316 = arith.divf %314, %315 : vector<2x32xf32>
    %317 = vector.extract_strided_slice %310 {offsets = [0, 32], sizes = [2, 32], strides = [1, 1]} : vector<2x128xf32> to vector<2x32xf32>
    %318 = arith.negf %317 : vector<2x32xf32>
    %319 = math.exp %318 : vector<2x32xf32>
    %cst_75 = arith.constant 1.000000e+00 : f32
    %320 = vector.broadcast %cst_75 : f32 to vector<2x32xf32>
    %321 = arith.addf %320, %319 : vector<2x32xf32>
    %322 = arith.divf %320, %321 : vector<2x32xf32>
    %323 = vector.extract_strided_slice %310 {offsets = [0, 64], sizes = [2, 32], strides = [1, 1]} : vector<2x128xf32> to vector<2x32xf32>
    %324 = math.tanh %323 : vector<2x32xf32>
    %325 = vector.extract_strided_slice %310 {offsets = [0, 96], sizes = [2, 32], strides = [1, 1]} : vector<2x128xf32> to vector<2x32xf32>
    %326 = arith.negf %325 : vector<2x32xf32>
    %327 = math.exp %326 : vector<2x32xf32>
    %cst_76 = arith.constant 1.000000e+00 : f32
    %328 = vector.broadcast %cst_76 : f32 to vector<2x32xf32>
    %329 = arith.addf %328, %327 : vector<2x32xf32>
    %330 = arith.divf %328, %329 : vector<2x32xf32>
    %331 = arith.mulf %322, %304 : vector<2x32xf32>
    %332 = arith.mulf %316, %324 : vector<2x32xf32>
    %333 = arith.addf %331, %332 : vector<2x32xf32>
    %334 = math.tanh %333 : vector<2x32xf32>
    %335 = arith.mulf %330, %334 : vector<2x32xf32>
    %c4_77 = arith.constant 4 : index
    %c0_78 = arith.constant 0 : index
    %336 = vector.load %arg7[%c4_77, %c0_78] : memref<16x32xf32, #tpu.memory_space<vmem>>, vector<2x32xf32>
    tpu.vector_store %arg7[%c4_77, %c0_78], %335 {strides = array<i32>} : memref<16x32xf32, #tpu.memory_space<vmem>>, vector<2x32xf32>,
    %337 = vector.extract_strided_slice %247 {offsets = [6, 0], sizes = [2, 128], strides = [1, 1]} : vector<16x128xf32> to vector<2x128xf32>
    %cst_79 = arith.constant dense<0.000000e+00> : vector<2x128xf32>
    %338 = tpu.matmul %335, %243, %cst_79 {dimension_numbers = #tpu.dot_dimension_numbers<[1], [0], [0], [1], [0, 0, 1, 1], [], []>} : vector<2x32xf32>, vector<32x128xf32>, vector<2x128xf32> -> vector<2x128xf32>
    %339 = arith.addf %337, %338 : vector<2x128xf32>
    %340 = vector.extract_strided_slice %339 {offsets = [0, 0], sizes = [2, 32], strides = [1, 1]} : vector<2x128xf32> to vector<2x32xf32>
    %341 = arith.negf %340 : vector<2x32xf32>
    %342 = math.exp %341 : vector<2x32xf32>
    %cst_80 = arith.constant 1.000000e+00 : f32
    %343 = vector.broadcast %cst_80 : f32 to vector<2x32xf32>
    %344 = arith.addf %343, %342 : vector<2x32xf32>
    %345 = arith.divf %343, %344 : vector<2x32xf32>
    %346 = vector.extract_strided_slice %339 {offsets = [0, 32], sizes = [2, 32], strides = [1, 1]} : vector<2x128xf32> to vector<2x32xf32>
    %347 = arith.negf %346 : vector<2x32xf32>
    %348 = math.exp %347 : vector<2x32xf32>
    %cst_81 = arith.constant 1.000000e+00 : f32
    %349 = vector.broadcast %cst_81 : f32 to vector<2x32xf32>
    %350 = arith.addf %349, %348 : vector<2x32xf32>
    %351 = arith.divf %349, %350 : vector<2x32xf32>
    %352 = vector.extract_strided_slice %339 {offsets = [0, 64], sizes = [2, 32], strides = [1, 1]} : vector<2x128xf32> to vector<2x32xf32>
    %353 = math.tanh %352 : vector<2x32xf32>
    %354 = vector.extract_strided_slice %339 {offsets = [0, 96], sizes = [2, 32], strides = [1, 1]} : vector<2x128xf32> to vector<2x32xf32>
    %355 = arith.negf %354 : vector<2x32xf32>
    %356 = math.exp %355 : vector<2x32xf32>
    %cst_82 = arith.constant 1.000000e+00 : f32
    %357 = vector.broadcast %cst_82 : f32 to vector<2x32xf32>
    %358 = arith.addf %357, %356 : vector<2x32xf32>
    %359 = arith.divf %357, %358 : vector<2x32xf32>
    %360 = arith.mulf %351, %333 : vector<2x32xf32>
    %361 = arith.mulf %345, %353 : vector<2x32xf32>
    %362 = arith.addf %360, %361 : vector<2x32xf32>
    %363 = math.tanh %362 : vector<2x32xf32>
    %364 = arith.mulf %359, %363 : vector<2x32xf32>
    %c6_83 = arith.constant 6 : index
    %c0_84 = arith.constant 0 : index
    %365 = vector.load %arg7[%c6_83, %c0_84] : memref<16x32xf32, #tpu.memory_space<vmem>>, vector<2x32xf32>
    tpu.vector_store %arg7[%c6_83, %c0_84], %364 {strides = array<i32>} : memref<16x32xf32, #tpu.memory_space<vmem>>, vector<2x32xf32>,
    %366 = vector.extract_strided_slice %247 {offsets = [8, 0], sizes = [2, 128], strides = [1, 1]} : vector<16x128xf32> to vector<2x128xf32>
    %cst_85 = arith.constant dense<0.000000e+00> : vector<2x128xf32>
    %367 = tpu.matmul %364, %243, %cst_85 {dimension_numbers = #tpu.dot_dimension_numbers<[1], [0], [0], [1], [0, 0, 1, 1], [], []>} : vector<2x32xf32>, vector<32x128xf32>, vector<2x128xf32> -> vector<2x128xf32>
    %368 = arith.addf %366, %367 : vector<2x128xf32>
    %369 = vector.extract_strided_slice %368 {offsets = [0, 0], sizes = [2, 32], strides = [1, 1]} : vector<2x128xf32> to vector<2x32xf32>
    %370 = arith.negf %369 : vector<2x32xf32>
    %371 = math.exp %370 : vector<2x32xf32>
    %cst_86 = arith.constant 1.000000e+00 : f32
    %372 = vector.broadcast %cst_86 : f32 to vector<2x32xf32>
    %373 = arith.addf %372, %371 : vector<2x32xf32>
    %374 = arith.divf %372, %373 : vector<2x32xf32>
    %375 = vector.extract_strided_slice %368 {offsets = [0, 32], sizes = [2, 32], strides = [1, 1]} : vector<2x128xf32> to vector<2x32xf32>
    %376 = arith.negf %375 : vector<2x32xf32>
    %377 = math.exp %376 : vector<2x32xf32>
    %cst_87 = arith.constant 1.000000e+00 : f32
    %378 = vector.broadcast %cst_87 : f32 to vector<2x32xf32>
    %379 = arith.addf %378, %377 : vector<2x32xf32>
    %380 = arith.divf %378, %379 : vector<2x32xf32>
    %381 = vector.extract_strided_slice %368 {offsets = [0, 64], sizes = [2, 32], strides = [1, 1]} : vector<2x128xf32> to vector<2x32xf32>
    %382 = math.tanh %381 : vector<2x32xf32>
    %383 = vector.extract_strided_slice %368 {offsets = [0, 96], sizes = [2, 32], strides = [1, 1]} : vector<2x128xf32> to vector<2x32xf32>
    %384 = arith.negf %383 : vector<2x32xf32>
    %385 = math.exp %384 : vector<2x32xf32>
    %cst_88 = arith.constant 1.000000e+00 : f32
    %386 = vector.broadcast %cst_88 : f32 to vector<2x32xf32>
    %387 = arith.addf %386, %385 : vector<2x32xf32>
    %388 = arith.divf %386, %387 : vector<2x32xf32>
    %389 = arith.mulf %380, %362 : vector<2x32xf32>
    %390 = arith.mulf %374, %382 : vector<2x32xf32>
    %391 = arith.addf %389, %390 : vector<2x32xf32>
    %392 = math.tanh %391 : vector<2x32xf32>
    %393 = arith.mulf %388, %392 : vector<2x32xf32>
    %c8_89 = arith.constant 8 : index
    %c0_90 = arith.constant 0 : index
    %394 = vector.load %arg7[%c8_89, %c0_90] : memref<16x32xf32, #tpu.memory_space<vmem>>, vector<2x32xf32>
    tpu.vector_store %arg7[%c8_89, %c0_90], %393 {strides = array<i32>} : memref<16x32xf32, #tpu.memory_space<vmem>>, vector<2x32xf32>,
    %395 = vector.extract_strided_slice %247 {offsets = [10, 0], sizes = [2, 128], strides = [1, 1]} : vector<16x128xf32> to vector<2x128xf32>
    %cst_91 = arith.constant dense<0.000000e+00> : vector<2x128xf32>
    %396 = tpu.matmul %393, %243, %cst_91 {dimension_numbers = #tpu.dot_dimension_numbers<[1], [0], [0], [1], [0, 0, 1, 1], [], []>} : vector<2x32xf32>, vector<32x128xf32>, vector<2x128xf32> -> vector<2x128xf32>
    %397 = arith.addf %395, %396 : vector<2x128xf32>
    %398 = vector.extract_strided_slice %397 {offsets = [0, 0], sizes = [2, 32], strides = [1, 1]} : vector<2x128xf32> to vector<2x32xf32>
    %399 = arith.negf %398 : vector<2x32xf32>
    %400 = math.exp %399 : vector<2x32xf32>
    %cst_92 = arith.constant 1.000000e+00 : f32
    %401 = vector.broadcast %cst_92 : f32 to vector<2x32xf32>
    %402 = arith.addf %401, %400 : vector<2x32xf32>
    %403 = arith.divf %401, %402 : vector<2x32xf32>
    %404 = vector.extract_strided_slice %397 {offsets = [0, 32], sizes = [2, 32], strides = [1, 1]} : vector<2x128xf32> to vector<2x32xf32>
    %405 = arith.negf %404 : vector<2x32xf32>
    %406 = math.exp %405 : vector<2x32xf32>
    %cst_93 = arith.constant 1.000000e+00 : f32
    %407 = vector.broadcast %cst_93 : f32 to vector<2x32xf32>
    %408 = arith.addf %407, %406 : vector<2x32xf32>
    %409 = arith.divf %407, %408 : vector<2x32xf32>
    %410 = vector.extract_strided_slice %397 {offsets = [0, 64], sizes = [2, 32], strides = [1, 1]} : vector<2x128xf32> to vector<2x32xf32>
    %411 = math.tanh %410 : vector<2x32xf32>
    %412 = vector.extract_strided_slice %397 {offsets = [0, 96], sizes = [2, 32], strides = [1, 1]} : vector<2x128xf32> to vector<2x32xf32>
    %413 = arith.negf %412 : vector<2x32xf32>
    %414 = math.exp %413 : vector<2x32xf32>
    %cst_94 = arith.constant 1.000000e+00 : f32
    %415 = vector.broadcast %cst_94 : f32 to vector<2x32xf32>
    %416 = arith.addf %415, %414 : vector<2x32xf32>
    %417 = arith.divf %415, %416 : vector<2x32xf32>
    %418 = arith.mulf %409, %391 : vector<2x32xf32>
    %419 = arith.mulf %403, %411 : vector<2x32xf32>
    %420 = arith.addf %418, %419 : vector<2x32xf32>
    %421 = math.tanh %420 : vector<2x32xf32>
    %422 = arith.mulf %417, %421 : vector<2x32xf32>
    %c10_95 = arith.constant 10 : index
    %c0_96 = arith.constant 0 : index
    %423 = vector.load %arg7[%c10_95, %c0_96] : memref<16x32xf32, #tpu.memory_space<vmem>>, vector<2x32xf32>
    tpu.vector_store %arg7[%c10_95, %c0_96], %422 {strides = array<i32>} : memref<16x32xf32, #tpu.memory_space<vmem>>, vector<2x32xf32>,
    %424 = vector.extract_strided_slice %247 {offsets = [12, 0], sizes = [2, 128], strides = [1, 1]} : vector<16x128xf32> to vector<2x128xf32>
    %cst_97 = arith.constant dense<0.000000e+00> : vector<2x128xf32>
    %425 = tpu.matmul %422, %243, %cst_97 {dimension_numbers = #tpu.dot_dimension_numbers<[1], [0], [0], [1], [0, 0, 1, 1], [], []>} : vector<2x32xf32>, vector<32x128xf32>, vector<2x128xf32> -> vector<2x128xf32>
    %426 = arith.addf %424, %425 : vector<2x128xf32>
    %427 = vector.extract_strided_slice %426 {offsets = [0, 0], sizes = [2, 32], strides = [1, 1]} : vector<2x128xf32> to vector<2x32xf32>
    %428 = arith.negf %427 : vector<2x32xf32>
    %429 = math.exp %428 : vector<2x32xf32>
    %cst_98 = arith.constant 1.000000e+00 : f32
    %430 = vector.broadcast %cst_98 : f32 to vector<2x32xf32>
    %431 = arith.addf %430, %429 : vector<2x32xf32>
    %432 = arith.divf %430, %431 : vector<2x32xf32>
    %433 = vector.extract_strided_slice %426 {offsets = [0, 32], sizes = [2, 32], strides = [1, 1]} : vector<2x128xf32> to vector<2x32xf32>
    %434 = arith.negf %433 : vector<2x32xf32>
    %435 = math.exp %434 : vector<2x32xf32>
    %cst_99 = arith.constant 1.000000e+00 : f32
    %436 = vector.broadcast %cst_99 : f32 to vector<2x32xf32>
    %437 = arith.addf %436, %435 : vector<2x32xf32>
    %438 = arith.divf %436, %437 : vector<2x32xf32>
    %439 = vector.extract_strided_slice %426 {offsets = [0, 64], sizes = [2, 32], strides = [1, 1]} : vector<2x128xf32> to vector<2x32xf32>
    %440 = math.tanh %439 : vector<2x32xf32>
    %441 = vector.extract_strided_slice %426 {offsets = [0, 96], sizes = [2, 32], strides = [1, 1]} : vector<2x128xf32> to vector<2x32xf32>
    %442 = arith.negf %441 : vector<2x32xf32>
    %443 = math.exp %442 : vector<2x32xf32>
    %cst_100 = arith.constant 1.000000e+00 : f32
    %444 = vector.broadcast %cst_100 : f32 to vector<2x32xf32>
    %445 = arith.addf %444, %443 : vector<2x32xf32>
    %446 = arith.divf %444, %445 : vector<2x32xf32>
    %447 = arith.mulf %438, %420 : vector<2x32xf32>
    %448 = arith.mulf %432, %440 : vector<2x32xf32>
    %449 = arith.addf %447, %448 : vector<2x32xf32>
    %450 = math.tanh %449 : vector<2x32xf32>
    %451 = arith.mulf %446, %450 : vector<2x32xf32>
    %c12_101 = arith.constant 12 : index
    %c0_102 = arith.constant 0 : index
    %452 = vector.load %arg7[%c12_101, %c0_102] : memref<16x32xf32, #tpu.memory_space<vmem>>, vector<2x32xf32>
    tpu.vector_store %arg7[%c12_101, %c0_102], %451 {strides = array<i32>} : memref<16x32xf32, #tpu.memory_space<vmem>>, vector<2x32xf32>,
    %453 = vector.extract_strided_slice %247 {offsets = [14, 0], sizes = [2, 128], strides = [1, 1]} : vector<16x128xf32> to vector<2x128xf32>
    %cst_103 = arith.constant dense<0.000000e+00> : vector<2x128xf32>
    %454 = tpu.matmul %451, %243, %cst_103 {dimension_numbers = #tpu.dot_dimension_numbers<[1], [0], [0], [1], [0, 0, 1, 1], [], []>} : vector<2x32xf32>, vector<32x128xf32>, vector<2x128xf32> -> vector<2x128xf32>
    %455 = arith.addf %453, %454 : vector<2x128xf32>
    %456 = vector.extract_strided_slice %455 {offsets = [0, 0], sizes = [2, 32], strides = [1, 1]} : vector<2x128xf32> to vector<2x32xf32>
    %457 = arith.negf %456 : vector<2x32xf32>
    %458 = math.exp %457 : vector<2x32xf32>
    %cst_104 = arith.constant 1.000000e+00 : f32
    %459 = vector.broadcast %cst_104 : f32 to vector<2x32xf32>
    %460 = arith.addf %459, %458 : vector<2x32xf32>
    %461 = arith.divf %459, %460 : vector<2x32xf32>
    %462 = vector.extract_strided_slice %455 {offsets = [0, 32], sizes = [2, 32], strides = [1, 1]} : vector<2x128xf32> to vector<2x32xf32>
    %463 = arith.negf %462 : vector<2x32xf32>
    %464 = math.exp %463 : vector<2x32xf32>
    %cst_105 = arith.constant 1.000000e+00 : f32
    %465 = vector.broadcast %cst_105 : f32 to vector<2x32xf32>
    %466 = arith.addf %465, %464 : vector<2x32xf32>
    %467 = arith.divf %465, %466 : vector<2x32xf32>
    %468 = vector.extract_strided_slice %455 {offsets = [0, 64], sizes = [2, 32], strides = [1, 1]} : vector<2x128xf32> to vector<2x32xf32>
    %469 = math.tanh %468 : vector<2x32xf32>
    %470 = vector.extract_strided_slice %455 {offsets = [0, 96], sizes = [2, 32], strides = [1, 1]} : vector<2x128xf32> to vector<2x32xf32>
    %471 = arith.negf %470 : vector<2x32xf32>
    %472 = math.exp %471 : vector<2x32xf32>
    %cst_106 = arith.constant 1.000000e+00 : f32
    %473 = vector.broadcast %cst_106 : f32 to vector<2x32xf32>
    %474 = arith.addf %473, %472 : vector<2x32xf32>
    %475 = arith.divf %473, %474 : vector<2x32xf32>
    %476 = arith.mulf %467, %449 : vector<2x32xf32>
    %477 = arith.mulf %461, %469 : vector<2x32xf32>
    %478 = arith.addf %476, %477 : vector<2x32xf32>
    %479 = math.tanh %478 : vector<2x32xf32>
    %480 = arith.mulf %475, %479 : vector<2x32xf32>
    %c14_107 = arith.constant 14 : index
    %c0_108 = arith.constant 0 : index
    %481 = vector.load %arg7[%c14_107, %c0_108] : memref<16x32xf32, #tpu.memory_space<vmem>>, vector<2x32xf32>
    tpu.vector_store %arg7[%c14_107, %c0_108], %480 {strides = array<i32>} : memref<16x32xf32, #tpu.memory_space<vmem>>, vector<2x32xf32>,
    return
  }
}

</mosaic_0001>

<bundles_post_ra>
// kernel: encoder_forward_pallas.1
= control target key start
LH: loop header
LB: loop body
LE: loop exit
PB: predicated region body
PF: predicated region fallthrough
CT: control target
= control target key end

     0   :  { %12 = vsyncpa [#allocation4], 0  ;;  %s2979_s0 = inlined_call_operand.vmem [shape: f32[16,16], index: 0, kind: input, shape index: {}]   ;;  %s2980_s1 = inlined_call_operand.hbm [shape: f32[16,128], index: 1, kind: input, shape index: {}]   ;;  %s2981_s2 = inlined_call_operand.vmem [shape: f32[32,128], index: 2, kind: input, shape index: {}]   ;;  %s2982_s3 = inlined_call_operand.vmem [shape: f32[1,128], index: 3, kind: input, shape index: {}]   ;;  %s2983_s4 = inlined_call_operand.hbm [shape: f32[32,128], index: 4, kind: input, shape index: {}]   ;;  %s2984_s5 = inlined_call_operand.hbm [shape: f32[32,128], index: 5, kind: input, shape index: {}]   ;;  %s2985_s6 = inlined_call_operand.vmem [shape: f32[1,128], index: 6, kind: input, shape index: {}]   ;;  %s2986_s7 = inlined_call_operand.vmem [shape: f32[16,32], index: 7, kind: output, shape index: {}]  }
   0x1   :  { %13 = vsyncpa [#allocation6], 0  ;;  %s2533_s24 = smov [#allocation5]   ;;  %s2534_s26 = smov [#allocation3]  }
   0x2   :  { %s37_s25 = sshll.u32 %s2533_s24, 4  ;;  %s21_s27 = sshll.u32 %s2534_s26, 4  ;;  %s38_s25 = int_to_ptr.vmem [resolvable:$true] %s37_s25  ;;  %s22_s27 = int_to_ptr.vmem [resolvable:$true] %s21_s27 }
   0x3   :  { %s2477_s28 = scalar_lea.vmem %s38_s25, 512  ;;  %p2482_p1 = scmp.lt.s32.totalorder %s38_s25, %s38_s25 }
   0x4   :  { %p2478_p0 = scmp.ne.s32.totalorder %s38_s25, %s2477_s28  ;;  %p2483_p2 = scmp.lt.s32.totalorder %s2477_s28, %s2477_s28 }
   0x6   :  { %p2484_p3 = por %p2483_p2, %p2482_p1 }
   0x8   :  { %p2485_p4 = pnand %p2484_p3, %p2478_p0 }
   0xa   :  { %2488 = shalt.err (!%p2485_p4)
}
   0xb   :  { %s2535_s29 = smov 128   ;;  %s2536_s30 = smov 8  }
   0xc   :  { %43 = dma.hbm_to_vmem [thread:$0]  %s2983_s4, 512, %s38_s25, [#allocation6], %s2535_s29, %s2535_s29, %s2536_s30  }
   0xd   :  { %s2497_s10 = scalar_lea.vmem %s22_s27, 256  ;;  %p2502_p6 = scmp.lt.s32.totalorder %s22_s27, %s22_s27 }
   0xe   :  { %p2498_p5 = scmp.ne.s32.totalorder %s22_s27, %s2497_s10  ;;  %p2503_p7 = scmp.lt.s32.totalorder %s2497_s10, %s2497_s10 }
  0x10   :  { %p2504_p8 = por %p2503_p7, %p2502_p6 }
  0x12   :  { %p2505_p9 = pnand %p2504_p8, %p2498_p5 }
  0x14   :  { %2508 = shalt.err (!%p2505_p9)
}
  0x15   :  { %27 = dma.hbm_to_vmem [thread:$0]  %s2980_s1, 256, %s22_s27, [#allocation4], %s2535_s29, %s2535_s29, %s2536_s30  }
  0x16   :  { %s2537_s13 = smov [#allocation7]  }
  0x17   :  { %s49_s14 = sshll.u32 %s2537_s13, 4  ;;  %s50_s14 = int_to_ptr.vmem [resolvable:$true] %s49_s14 }
  0x18   :  { %s2517_s15 = scalar_lea.vmem %s50_s14, 512  ;;  %p2522_p11 = scmp.lt.s32.totalorder %s50_s14, %s50_s14 }
  0x19   :  { %p2518_p10 = scmp.ne.s32.totalorder %s50_s14, %s2517_s15  ;;  %p2523_p12 = scmp.lt.s32.totalorder %s2517_s15, %s2517_s15 }
  0x1b   :  { %p2524_p13 = por %p2523_p12, %p2522_p11 }
  0x1d   :  { %p2525_p0 = pnand %p2524_p13, %p2518_p10 }
  0x1f   :  { %2528 = shalt.err (!%p2525_p0)
}
  0x20   :  { %55 = dma.hbm_to_vmem [thread:$0]  %s2984_s5, 512, %s50_s14, [#allocation6], %s2535_s29, %s2535_s29, %s2536_s30  }
  0x21   :  { %2529 = dma.done.wait [#allocation4], 256  }
  0x22   :  { %2530 = vsyncadd [#allocation4], 4294967040 }
  0x23   :  { %2531 = dma.done.wait [#allocation6], 1024  }
  0x24   :  { %2532 = vsyncadd [#allocation6], 4294966272  ;;  %v2538_v0 = vmov 0.0   ;;  %vm2539_vm0 = vmmov 0   ;;  %v70_v1 = vld [vmem:[#allocation3 + $0x8] sm:$0xff]  ;;  %v69_v3 = vld [vmem:[#allocation3] sm:$0xff] }
  0x25   :  { %2145 = vmatprep.subr.mxu1 %v2538_v0  ;;  %2153 = vmatprep.mubr.msk.f32.mxu1 %vm2539_vm0, %v2538_v0  ;;  %v2597_v2 = vld [vmem:[%s2981_s2 + $0x18] sm:$0xff]  ;;  %v2603_v4 = vld [vmem:[%s2981_s2 + $0x10] sm:$0xff]  ;;  %v67_v5 = vld [vmem:[%s2979_s0] sm:$0xff]  ;;  %vm82_vm1 = vcmask 130048   ;;  %s2540_s27 = smov 64   ;;  %vm267_vm2 = vcmask 254976  }
  0x26   :  { %2138 = vmatprep.subr.mxu0 %v70_v1  ;;  %2146 = vmatpush3.msra.mxu1 %v2597_v2  ;;  %v68_v6 = vld [vmem:[%s2979_s0 + $0x8] sm:$0xff]  ;;  %v2622_v8 = vld [vmem:[%s2981_s2] sm:$0xff]  ;;  %vm164_vm3 = vcmask 261120   ;;  %vm376_vm4 = vcmask 257026   ;;  %vm600_vm5 = vcmask 261126   ;;  %vm488_vm6 = vcmask 259076  }
  0x27   :  { %2139 = vmatpush3.msra.mxu0 %v70_v1  ;;  %2147 = vmatprep.subr.mxu1 %v2538_v0  ;;  %v2616_v7 = vld [vmem:[%s2981_s2 + $0x8] sm:$0xff]  ;;  %v2012_v9 = vld [vmem:[%s2982_s3] ss:$0 sm:$0xff]  ;;  %s2541_s3 = smov 32  }
  0x28   :  { %2140 = vmatprep.subr.mxu0 %v69_v3  ;;  %2148 = vmatpush3.msra.mxu1 %v2603_v4 }
  0x29   :  { %2141 = vmatpush3.msra.mxu0 %v69_v3  ;;  %2142 = vmatprep.mubr.msk.f32.mxu0 %vm82_vm1, %v67_v5 }
  0x2a   :  { %2149 = vmatprep.subr.mxu1 %v2538_v0  ;;  %2143 = vmatmul.mubr.msk.f32.vlgmr.msra.gmra.mxu0 %vm82_vm1, %v68_v6 }
  0x2b   :  { %2150 = vmatpush3.msra.mxu1 %v2616_v7  ;;  %2156 = vmatprep.subr.mxu0 %v2538_v0 }
  0x2c   :  { %2151 = vmatprep.subr.mxu1 %v2538_v0  ;;  %2157 = vmatpush3.msra.mxu0 %v2597_v2 }
  0x2d   :  { %2152 = vmatpush3.msra.mxu1 %v2622_v8  ;;  %2158 = vmatprep.subr.mxu0 %v2538_v0 }
  0x2e   :  { %2154 = vmatmul.mubr.f32.vlgmr.msra.gmra.mxu1 %v2538_v0  ;;  %2159 = vmatpush3.msra.mxu0 %v2603_v4 }
  0x2f   :  { %2160 = vmatprep.subr.mxu0 %v2538_v0  ;;  %2164 = vmatprep.mubr.msk.f32.mxu0 %vm2539_vm0, %v2538_v0 }
  0x30   :  { %2161 = vmatpush3.msra.mxu0 %v2616_v7  ;;  %2167 = vmatprep.subr.mxu1 %v2538_v0 }
  0x31   :  { %2162 = vmatprep.subr.mxu0 %v2538_v0  ;;  %2168 = vmatpush3.msra.mxu1 %v2597_v2 }
  0x32   :  { %2163 = vmatpush3.msra.mxu0 %v2622_v8  ;;  %2169 = vmatprep.subr.mxu1 %v2538_v0 }
  0x33   :  { %2170 = vmatpush3.msra.mxu1 %v2603_v4  ;;  %2175 = vmatprep.mubr.msk.f32.mxu1 %vm2539_vm0, %v2538_v0 }
  0x34   :  { %2171 = vmatprep.subr.mxu1 %v2538_v0  ;;  %2178 = vmatprep.subr.mxu0 %v2538_v0 }
  0x35   :  { %2172 = vmatpush3.msra.mxu1 %v2616_v7 }
  0x36   :  { %2173 = vmatprep.subr.mxu1 %v2538_v0 }
  0x37   :  { %2174 = vmatpush3.msra.mxu1 %v2622_v8 }
  0x38   :  { %2189 = vmatprep.subr.mxu1 %v2538_v0 }
  0xea   :  { %v2144_v10 = vpop.f32.mrf.mxu0 }
  0xeb   :  { %v2653_v11 = vadd.f32 %v2144_v10, %v2012_v9 }
  0xec   :  { %v155_v12 = vpop.f32.mrf.mxu0 }
  0xed   :  { %v2655_v13 = vadd.f32 %v2012_v9, %v155_v12 }
  0xee   :  { %v234_v14 = vpop.f32.mrf.mxu1 }
  0xef   :  { %v238_v15 = vadd.f32 %v234_v14, %v2655_v13 }
  0xf0   :  { %v2155_v16 = vpop.f32.mrf.mxu1 }
  0xf1   :  { %2341 = vtanh.f32 %v238_v15  ;;  %v2015_v18 = vmul.f32 -1.442695, %v238_v15 }
  0xf3   :  { %2343 = vpow2.f32 %v2015_v18 }
  0xfe   :  { %v2342_v17 = vpop.eup %2341 }
  0xff   :  { %248 = vrot.lane.b32.xlu0 %v2342_v17, %s2540_s27 }
 0x100   :  { %v2344_v19 = vpop.eup %2343 }
 0x101   :  { %v242_v20 = vadd.f32 1.0, %v2344_v19 }
 0x103   :  { %2345 = vrcp.f32 %v242_v20 }
 0x110   :  { %v2346_v21 = vpop.eup %2345 }
 0x111   :  { %v246_v24 = vmul.f32 0.0, %v2346_v21 }
 0x171   :  { %v249_v22 = vpop.permute.xlu0 %248 }
 0x172   :  { %v251_v23 = vmul.f32 %v2346_v21, %v249_v22 }
 0x174   :  { %253 = vrot.lane.b32.xlu0 %v251_v23, %s2541_s3 }
 0x1e6   :  { %v254_v25 = vpop.permute.xlu0 %253 }
 0x1e7   :  { %v256_v26 = vadd.f32 %v254_v25, %v246_v24 }
 0x1e9   :  { %2347 = vtanh.f32 %v256_v26  ;;  %v353_v42 = vrot.slane %v256_v26, 6 }
 0x1f6   :  { %v2348_v27 = vpop.eup %2347 }
 0x1f7   :  { %259 = vrot.lane.b32.xlu1 %v2348_v27, %s2540_s27 }
 0x269   :  { %v260_v28 = vpop.permute.xlu1 %259 }
 0x26a   :  { %v262_v29 = vmul.f32 %v2346_v21, %v260_v28 }
 0x26c   :  { %264 = vrot.lane.b32.xlu1 %v262_v29, %s2541_s3 }
 0x2de   :  { %v265_v30 = vpop.permute.xlu1 %264 }
 0x2df   :  { %268 = vst.msk [vmem:[#allocation2] sm:$0x3] %vm267_vm2, %v265_v30  ;;  %2165 = vmatmul.mubr.msk.f32.vlgmr.msra.gmra.mxu0 %vm164_vm3, %v265_v30 }
 0x2e0   :  { %2179 = vmatpush3.msra.mxu0 %v2597_v2  ;;  %2186 = vmatprep.mubr.msk.f32.mxu0 %vm2539_vm0, %v2538_v0 }
 0x2e1   :  { %2180 = vmatprep.subr.mxu0 %v2538_v0 }
 0x2e2   :  { %2181 = vmatpush3.msra.mxu0 %v2603_v4 }
 0x2e3   :  { %2182 = vmatprep.subr.mxu0 %v2538_v0 }
 0x2e4   :  { %2183 = vmatpush3.msra.mxu0 %v2616_v7 }
 0x2e5   :  { %2184 = vmatprep.subr.mxu0 %v2538_v0 }
 0x2e6   :  { %2185 = vmatpush3.msra.mxu0 %v2622_v8 }
 0x2e7   :  { %2200 = vmatprep.subr.mxu0 %v2538_v0 }
 0x39f   :  { %v337_v31 = vpop.f32.mrf.mxu0 }
 0x3a0   :  { %v342_v32 = vrot.slane %v337_v31, 6 }
 0x3a1   :  { %v2166_v33 = vpop.f32.mrf.mxu0 }
 0x3a2   :  { %v344_v34 = vadd.f32 %v342_v32, %v2655_v13 }
 0x3a4   :  { %2349 = vtanh.f32 %v344_v34  ;;  %v2017_v36 = vmul.f32 -1.442695, %v344_v34 }
 0x3a6   :  { %2351 = vpow2.f32 %v2017_v36 }
 0x3b1   :  { %v2350_v35 = vpop.eup %2349 }
 0x3b2   :  { %357 = vrot.lane.b32.xlu0 %v2350_v35, %s2540_s27 }
 0x3b3   :  { %v2352_v37 = vpop.eup %2351 }
 0x3b4   :  { %v348_v38 = vadd.f32 1.0, %v2352_v37 }
 0x3b6   :  { %2353 = vrcp.f32 %v348_v38 }
 0x3c3   :  { %v2354_v39 = vpop.eup %2353 }
 0x3c4   :  { %v355_v43 = vmul.f32 %v2354_v39, %v353_v42 }
 0x424   :  { %v358_v40 = vpop.permute.xlu0 %357 }
 0x425   :  { %v360_v41 = vmul.f32 %v2354_v39, %v358_v40 }
 0x427   :  { %362 = vrot.lane.b32.xlu1 %v360_v41, %s2541_s3 }
 0x499   :  { %v363_v44 = vpop.permute.xlu1 %362 }
 0x49a   :  { %v365_v45 = vadd.f32 %v363_v44, %v355_v43 }
 0x49c   :  { %2355 = vtanh.f32 %v365_v45  ;;  %v465_v62 = vrot.slane %v365_v45, 6 }
 0x4a9   :  { %v2356_v46 = vpop.eup %2355 }
 0x4aa   :  { %368 = vrot.lane.b32.xlu0 %v2356_v46, %s2540_s27 }
 0x51c   :  { %v369_v47 = vpop.permute.xlu0 %368 }
 0x51d   :  { %v2678_v48 = vmul.f32 %v2354_v39, %v369_v47 }
 0x51f   :  { %v378_v49 = vrot.slane %v2678_v48, 2 }
 0x521   :  { %379 = vrot.lane.b32.xlu1 %v378_v49, %s2541_s3 }
 0x593   :  { %v380_v50 = vpop.permute.xlu1 %379 }
 0x594   :  { %2176 = vmatmul.mubr.msk.f32.vlgmr.msra.gmra.mxu1 %vm164_vm3, %v380_v50 }
 0x595   :  { %2190 = vmatpush3.msra.mxu1 %v2597_v2  ;;  %2197 = vmatprep.mubr.msk.f32.mxu1 %vm2539_vm0, %v2538_v0 }
 0x596   :  { %2191 = vmatprep.subr.mxu1 %v2538_v0 }
 0x597   :  { %2192 = vmatpush3.msra.mxu1 %v2603_v4 }
 0x598   :  { %2193 = vmatprep.subr.mxu1 %v2538_v0 }
 0x599   :  { %2194 = vmatpush3.msra.mxu1 %v2616_v7 }
 0x59a   :  { %2195 = vmatprep.subr.mxu1 %v2538_v0 }
 0x59b   :  { %2196 = vmatpush3.msra.mxu1 %v2622_v8 }
 0x59c   :  { %2211 = vmatprep.subr.mxu1 %v2538_v0 }
 0x654   :  { %v449_v51 = vpop.f32.mrf.mxu1 }
 0x655   :  { %v454_v52 = vrot.slane %v449_v51, 4 }
 0x656   :  { %v2177_v53 = vpop.f32.mrf.mxu1 }
 0x657   :  { %v456_v54 = vadd.f32 %v454_v52, %v2655_v13 }
 0x659   :  { %2357 = vtanh.f32 %v456_v54  ;;  %v2019_v56 = vmul.f32 -1.442695, %v456_v54 }
 0x65b   :  { %2359 = vpow2.f32 %v2019_v56 }
 0x666   :  { %v2358_v55 = vpop.eup %2357 }
 0x667   :  { %469 = vrot.lane.b32.xlu0 %v2358_v55, %s2540_s27 }
 0x668   :  { %v2360_v57 = vpop.eup %2359 }
 0x669   :  { %v460_v58 = vadd.f32 1.0, %v2360_v57 }
 0x66b   :  { %2361 = vrcp.f32 %v460_v58 }
 0x678   :  { %v2362_v59 = vpop.eup %2361 }
 0x679   :  { %v467_v63 = vmul.f32 %v2362_v59, %v465_v62 }
 0x6d9   :  { %v470_v60 = vpop.permute.xlu0 %469 }
 0x6da   :  { %v472_v61 = vmul.f32 %v2362_v59, %v470_v60 }
 0x6dc   :  { %474 = vrot.lane.b32.xlu1 %v472_v61, %s2541_s3 }
 0x74e   :  { %v475_v1 = vpop.permute.xlu1 %474 }
 0x74f   :  { %v477_v3 = vadd.f32 %v475_v1, %v467_v63 }
 0x751   :  { %2363 = vtanh.f32 %v477_v3  ;;  %v577_v25 = vrot.slane %v477_v3, 6 }
 0x75e   :  { %v2364_v5 = vpop.eup %2363 }
 0x75f   :  { %480 = vrot.lane.b32.xlu0 %v2364_v5, %s2540_s27 }
 0x7d1   :  { %v481_v6 = vpop.permute.xlu0 %480 }
 0x7d2   :  { %v2697_v9 = vmul.f32 %v2362_v59, %v481_v6 }
 0x7d4   :  { %v490_v10 = vrot.slane %v2697_v9, 4 }
 0x7d6   :  { %491 = vrot.lane.b32.xlu1 %v490_v10, %s2541_s3 }
 0x848   :  { %v492_v12 = vpop.permute.xlu1 %491 }
 0x849   :  { %2187 = vmatmul.mubr.msk.f32.vlgmr.msra.gmra.mxu0 %vm164_vm3, %v492_v12 }
 0x84a   :  { %2201 = vmatpush3.msra.mxu0 %v2597_v2  ;;  %2208 = vmatprep.mubr.msk.f32.mxu0 %vm2539_vm0, %v2538_v0 }
 0x84b   :  { %2202 = vmatprep.subr.mxu0 %v2538_v0 }
 0x84c   :  { %2203 = vmatpush3.msra.mxu0 %v2603_v4 }
 0x84d   :  { %2204 = vmatprep.subr.mxu0 %v2538_v0 }
 0x84e   :  { %2205 = vmatpush3.msra.mxu0 %v2616_v7 }
 0x84f   :  { %2206 = vmatprep.subr.mxu0 %v2538_v0 }
 0x850   :  { %2207 = vmatpush3.msra.mxu0 %v2622_v8 }
 0x851   :  { %2222 = vmatprep.subr.mxu0 %v2538_v0 }
 0x909   :  { %v561_v14 = vpop.f32.mrf.mxu0 }
 0x90a   :  { %v566_v15 = vrot.slane %v561_v14, 2 }
 0x90b   :  { %v2188_v16 = vpop.f32.mrf.mxu0 }
 0x90c   :  { %v568_v17 = vadd.f32 %v566_v15, %v2655_v13 }
 0x90e   :  { %2365 = vtanh.f32 %v568_v17  ;;  %v2021_v19 = vmul.f32 -1.442695, %v568_v17 }
 0x910   :  { %2367 = vpow2.f32 %v2021_v19 }
 0x91b   :  { %v2366_v18 = vpop.eup %2365 }
 0x91c   :  { %581 = vrot.lane.b32.xlu0 %v2366_v18, %s2540_s27 }
 0x91d   :  { %v2368_v20 = vpop.eup %2367 }
 0x91e   :  { %v572_v21 = vadd.f32 1.0, %v2368_v20 }
 0x920   :  { %2369 = vrcp.f32 %v572_v21 }
 0x92d   :  { %v2370_v22 = vpop.eup %2369 }
 0x92e   :  { %v579_v26 = vmul.f32 %v2370_v22, %v577_v25 }
 0x98e   :  { %v582_v23 = vpop.permute.xlu0 %581 }
 0x98f   :  { %v584_v24 = vmul.f32 %v2370_v22, %v582_v23 }
 0x991   :  { %586 = vrot.lane.b32.xlu1 %v584_v24, %s2541_s3 }
 0xa03   :  { %v587_v27 = vpop.permute.xlu1 %586 }
 0xa04   :  { %v589_v28 = vadd.f32 %v587_v27, %v579_v26 }
 0xa06   :  { %2371 = vtanh.f32 %v589_v28  ;;  %v686_v43 = vrot.slane %v589_v28, 6 }
 0xa13   :  { %v2372_v13 = vpop.eup %2371 }
 0xa14   :  { %592 = vrot.lane.b32.xlu0 %v2372_v13, %s2540_s27 }
 0xa86   :  { %v593_v29 = vpop.permute.xlu0 %592 }
 0xa87   :  { %v2716_v30 = vmul.f32 %v2370_v22, %v593_v29 }
 0xa89   :  { %v602_v31 = vrot.slane %v2716_v30, 6 }
 0xa8b   :  { %603 = vrot.lane.b32.xlu1 %v602_v31, %s2541_s3 }
 0xafd   :  { %v604_v32 = vpop.permute.xlu1 %603 }
 0xafe   :  { %2198 = vmatmul.mubr.msk.f32.vlgmr.msra.gmra.mxu1 %vm164_vm3, %v604_v32 }
 0xaff   :  { %2212 = vmatpush3.msra.mxu1 %v2597_v2  ;;  %2219 = vmatprep.mubr.msk.f32.mxu1 %vm2539_vm0, %v2538_v0 }
 0xb00   :  { %2213 = vmatprep.subr.mxu1 %v2538_v0 }
 0xb01   :  { %2214 = vmatpush3.msra.mxu1 %v2603_v4 }
 0xb02   :  { %2215 = vmatprep.subr.mxu1 %v2538_v0 }
 0xb03   :  { %2216 = vmatpush3.msra.mxu1 %v2616_v7 }
 0xb04   :  { %2217 = vmatprep.subr.mxu1 %v2538_v0 }
 0xb05   :  { %2218 = vmatpush3.msra.mxu1 %v2622_v8 }
 0xbbe   :  { %v673_v33 = vpop.f32.mrf.mxu1 }
 0xbbf   :  { %v677_v34 = vadd.f32 %v673_v33, %v2653_v11 }
 0xbc0   :  { %v2199_v35 = vpop.f32.mrf.mxu1 }
 0xbc1   :  { %2373 = vtanh.f32 %v677_v34  ;;  %v2023_v37 = vmul.f32 -1.442695, %v677_v34 }
 0xbc3   :  { %2375 = vpow2.f32 %v2023_v37 }
 0xbce   :  { %v2374_v36 = vpop.eup %2373 }
 0xbcf   :  { %690 = vrot.lane.b32.xlu0 %v2374_v36, %s2540_s27 }
 0xbd0   :  { %v2376_v38 = vpop.eup %2375 }
 0xbd1   :  { %v681_v39 = vadd.f32 1.0, %v2376_v38 }
 0xbd3   :  { %2377 = vrcp.f32 %v681_v39 }
 0xbe0   :  { %v2378_v40 = vpop.eup %2377 }
 0xbe1   :  { %v688_v44 = vmul.f32 %v2378_v40, %v686_v43 }
 0xc41   :  { %v691_v41 = vpop.permute.xlu0 %690 }
 0xc42   :  { %v693_v42 = vmul.f32 %v2378_v40, %v691_v41 }
 0xc44   :  { %695 = vrot.lane.b32.xlu1 %v693_v42, %s2541_s3 }
 0xcb6   :  { %v696_v45 = vpop.permute.xlu1 %695 }
 0xcb7   :  { %v698_v46 = vadd.f32 %v696_v45, %v688_v44 }
 0xcb9   :  { %2379 = vtanh.f32 %v698_v46 }
 0xcc6   :  { %v2380_v47 = vpop.eup %2379 }
 0xcc7   :  { %701 = vrot.lane.b32.xlu0 %v2380_v47, %s2540_s27 }
 0xd39   :  { %v702_v49 = vpop.permute.xlu0 %701 }
 0xd3a   :  { %v704_v50 = vmul.f32 %v2378_v40, %v702_v49  ;;  %v1045_v49 = vld [vmem:[#allocation5 + $0x18] sm:$0xff] }
 0xd3b   :  { %2233 = vmatprep.subr.mxu1 %v1045_v49 }
 0xd3c   :  { %706 = vrot.lane.b32.xlu1 %v704_v50, %s2541_s3  ;;  %v1044_v50 = vld [vmem:[#allocation5 + $0x10] sm:$0xff] }
 0xdae   :  { %v707_v51 = vpop.permute.xlu1 %706 }
 0xdaf   :  { %709 = vst.msk [vmem:[#allocation2 + $0x8] sm:$0x3] %vm267_vm2, %v707_v51  ;;  %2209 = vmatmul.mubr.msk.f32.vlgmr.msra.gmra.mxu0 %vm164_vm3, %v707_v51  ;;  %v2780_v51 = vld [vmem:[#allocation7 + $0x18] sm:$0xff] }
 0xdb0   :  { %2223 = vmatpush3.msra.mxu0 %v2597_v2  ;;  %2230 = vmatprep.mubr.msk.f32.mxu0 %vm2539_vm0, %v2538_v0 }
 0xdb1   :  { %2224 = vmatprep.subr.mxu0 %v2538_v0 }
 0xdb2   :  { %2225 = vmatpush3.msra.mxu0 %v2603_v4 }
 0xdb3   :  { %2226 = vmatprep.subr.mxu0 %v2538_v0 }
 0xdb4   :  { %2227 = vmatpush3.msra.mxu0 %v2616_v7 }
 0xdb5   :  { %2228 = vmatprep.subr.mxu0 %v2538_v0 }
 0xdb6   :  { %2229 = vmatpush3.msra.mxu0 %v2622_v8  ;;  %v794_v8 = vrot.slane %v698_v46, 6 }
 0xdb7   :  { %2244 = vmatprep.subr.mxu0 %v2538_v0 }
 0xe6f   :  { %v778_v52 = vpop.f32.mrf.mxu0 }
 0xe70   :  { %v783_v53 = vrot.slane %v778_v52, 6  ;;  %v2783_v52 = vld [vmem:[#allocation7 + $0x10] sm:$0xff] }
 0xe71   :  { %v2210_v2 = vpop.f32.mrf.mxu0 }
 0xe72   :  { %v785_v54 = vadd.f32 %v783_v53, %v2653_v11  ;;  %v1043_v53 = vld [vmem:[#allocation5 + $0x8] sm:$0xff] }
 0xe73   :  { %v2786_v2 = vld [vmem:[#allocation7 + $0x8] sm:$0xff] }
 0xe74   :  { %2381 = vtanh.f32 %v785_v54  ;;  %v2025_v4 = vmul.f32 -1.442695, %v785_v54  ;;  %v2792_v54 = vld [vmem:[#allocation7] sm:$0xff] }
 0xe76   :  { %2383 = vpow2.f32 %v2025_v4 }
 0xe81   :  { %v2382_v55 = vpop.eup %2381 }
 0xe82   :  { %798 = vrot.lane.b32.xlu0 %v2382_v55, %s2540_s27 }
 0xe83   :  { %v2384_v56 = vpop.eup %2383 }
 0xe84   :  { %v789_v57 = vadd.f32 1.0, %v2384_v56 }
 0xe86   :  { %2385 = vrcp.f32 %v789_v57 }
 0xe93   :  { %v2386_v7 = vpop.eup %2385 }
 0xe94   :  { %v796_v60 = vmul.f32 %v2386_v7, %v794_v8 }
 0xef4   :  { %v799_v58 = vpop.permute.xlu0 %798 }
 0xef5   :  { %v801_v59 = vmul.f32 %v2386_v7, %v799_v58 }
 0xef7   :  { %803 = vrot.lane.b32.xlu1 %v801_v59, %s2541_s3 }
 0xf69   :  { %v804_v61 = vpop.permute.xlu1 %803 }
 0xf6a   :  { %v806_v62 = vadd.f32 %v804_v61, %v796_v60  ;;  %v2030_v61 = vld [vmem:[%s2985_s6] ss:$0 sm:$0xff] }
 0xf6c   :  { %2387 = vtanh.f32 %v806_v62  ;;  %v905_v23 = vrot.slane %v806_v62, 6 }
 0xf79   :  { %v2388_v63 = vpop.eup %2387 }
 0xf7a   :  { %809 = vrot.lane.b32.xlu0 %v2388_v63, %s2540_s27 }
 0xfec   :  { %v810_v1 = vpop.permute.xlu0 %809 }
 0xfed   :  { %v2751_v3 = vmul.f32 %v2386_v7, %v810_v1 }
 0xfef   :  { %v818_v5 = vrot.slane %v2751_v3, 2 }
 0xff1   :  { %819 = vrot.lane.b32.xlu1 %v818_v5, %s2541_s3 }
0x1063   :  { %v820_v6 = vpop.permute.xlu1 %819 }
0x1064   :  { %2220 = vmatmul.mubr.msk.f32.vlgmr.msra.gmra.mxu1 %vm164_vm3, %v820_v6 }
0x1065   :  { %2234 = vmatpush3.msra.mxu1 %v1045_v49 }
0x1066   :  { %2235 = vmatprep.subr.mxu1 %v1044_v50 }
0x1067   :  { %2236 = vmatpush3.msra.mxu1 %v1044_v50 }
0x1068   :  { %2237 = vmatprep.subr.mxu1 %v1043_v53 }
0x1069   :  { %2238 = vmatpush3.msra.mxu1 %v1043_v53 }
0x1124   :  { %v889_v10 = vpop.f32.mrf.mxu1 }
0x1125   :  { %v894_v12 = vrot.slane %v889_v10, 4 }
0x1126   :  { %v2221_v14 = vpop.f32.mrf.mxu1 }
0x1127   :  { %v896_v15 = vadd.f32 %v894_v12, %v2653_v11 }
0x1129   :  { %2389 = vtanh.f32 %v896_v15  ;;  %v2027_v17 = vmul.f32 -1.442695, %v896_v15 }
0x112b   :  { %2391 = vpow2.f32 %v2027_v17 }
0x1136   :  { %v2390_v16 = vpop.eup %2389 }
0x1137   :  { %909 = vrot.lane.b32.xlu0 %v2390_v16, %s2540_s27 }
0x1138   :  { %v2392_v18 = vpop.eup %2391 }
0x1139   :  { %v900_v19 = vadd.f32 1.0, %v2392_v18 }
0x113b   :  { %2393 = vrcp.f32 %v900_v19 }
0x1148   :  { %v2394_v20 = vpop.eup %2393 }
0x1149   :  { %v907_v24 = vmul.f32 %v2394_v20, %v905_v23 }
0x11a9   :  { %v910_v21 = vpop.permute.xlu0 %909 }
0x11aa   :  { %v912_v22 = vmul.f32 %v2394_v20, %v910_v21 }
0x11ac   :  { %914 = vrot.lane.b32.xlu1 %v912_v22, %s2541_s3 }
0x121e   :  { %v915_v25 = vpop.permute.xlu1 %914 }
0x121f   :  { %v917_v26 = vadd.f32 %v915_v25, %v907_v24 }
0x1221   :  { %2395 = vtanh.f32 %v917_v26 }
0x122e   :  { %v2396_v27 = vpop.eup %2395 }
0x122f   :  { %920 = vrot.lane.b32.xlu0 %v2396_v27, %s2540_s27 }
0x12a1   :  { %v921_v28 = vpop.permute.xlu0 %920 }
0x12a2   :  { %v923_v13 = vmul.f32 %v2394_v20, %v921_v28 }
0x12a4   :  { %v929_v29 = vrot.slane %v923_v13, 4 }
0x12a6   :  { %930 = vrot.lane.b32.xlu1 %v929_v29, %s2541_s3 }
0x1318   :  { %v931_v31 = vpop.permute.xlu1 %930 }
0x1319   :  { %2231 = vmatmul.mubr.msk.f32.vlgmr.msra.gmra.mxu0 %vm164_vm3, %v931_v31 }
0x131a   :  { %2252 = vmatprep.mubr.msk.f32.mxu0 %vm2539_vm0, %v2538_v0  ;;  %2245 = vmatpush3.msra.mxu0 %v2780_v51 }
0x131b   :  { %2246 = vmatprep.subr.mxu0 %v2538_v0 }
0x131c   :  { %2247 = vmatpush3.msra.mxu0 %v2783_v52 }
0x131d   :  { %2248 = vmatprep.subr.mxu0 %v2538_v0 }
0x131e   :  { %2249 = vmatpush3.msra.mxu0 %v2786_v2 }
0x131f   :  { %2250 = vmatprep.subr.mxu0 %v2538_v0 }
0x1320   :  { %2251 = vmatpush3.msra.mxu0 %v2792_v54 }
0x1321   :  { %2253 = vmatmul.mubr.f32.vlgmr.msra.gmra.mxu0 %v2538_v0  ;;  %2266 = vmatprep.subr.mxu0 %v2538_v0 }
0x1322   :  { %2267 = vmatpush3.msra.mxu0 %v2780_v51  ;;  %2274 = vmatprep.mubr.msk.f32.mxu0 %vm2539_vm0, %v2538_v0 }
0x1323   :  { %2268 = vmatprep.subr.mxu0 %v2538_v0 }
0x1324   :  { %2269 = vmatpush3.msra.mxu0 %v2783_v52 }
0x1325   :  { %2270 = vmatprep.subr.mxu0 %v2538_v0 }
0x1326   :  { %2271 = vmatpush3.msra.mxu0 %v2786_v2 }
0x1327   :  { %2272 = vmatprep.subr.mxu0 %v2538_v0 }
0x1328   :  { %2273 = vmatpush3.msra.mxu0 %v2792_v54 }
0x1329   :  { %2288 = vmatprep.subr.mxu0 %v2538_v0 }
0x13d9   :  { %v1000_v32 = vpop.f32.mrf.mxu0 }
0x13da   :  { %v1005_v33 = vrot.slane %v1000_v32, 2 }
0x13db   :  { %v2232_v34 = vpop.f32.mrf.mxu0 }
0x13dc   :  { %v1007_v35 = vadd.f32 %v1005_v33, %v2653_v11  ;;  %v1016_v11 = vrot.slane %v917_v26, 6 }
0x13de   :  { %2397 = vtanh.f32 %v1007_v35  ;;  %v2029_v37 = vmul.f32 -1.442695, %v1007_v35 }
0x13e0   :  { %2399 = vpow2.f32 %v2029_v37 }
0x13e1   :  { %v1204_v8 = vpop.f32.mrf.mxu0 }
0x13e3   :  { %v2254_v60 = vpop.f32.mrf.mxu0 }
0x13eb   :  { %v2398_v36 = vpop.eup %2397 }
0x13ec   :  { %1020 = vrot.lane.b32.xlu0 %v2398_v36, %s2540_s27 }
0x13ed   :  { %v2400_v38 = vpop.eup %2399 }
0x13ee   :  { %v1011_v39 = vadd.f32 1.0, %v2400_v38 }
0x13f0   :  { %2401 = vrcp.f32 %v1011_v39 }
0x13fd   :  { %v2402_v40 = vpop.eup %2401 }
0x13fe   :  { %v1018_v43 = vmul.f32 %v2402_v40, %v1016_v11 }
0x145e   :  { %v1021_v41 = vpop.permute.xlu0 %1020 }
0x145f   :  { %v1023_v42 = vmul.f32 %v2402_v40, %v1021_v41 }
0x1461   :  { %1025 = vrot.lane.b32.xlu1 %v1023_v42, %s2541_s3 }
0x1465   :  { %373 = vrot.lane.b32.xlu1 %v2678_v48, %s2541_s3 }
0x1469   :  { %597 = vrot.lane.b32.xlu1 %v2716_v30, %s2541_s3 }
0x146d   :  { %925 = vrot.lane.b32.xlu1 %v923_v13, %s2541_s3 }
0x14d3   :  { %v1026_v44 = vpop.permute.xlu1 %1025 }
0x14d4   :  { %v1028_v45 = vadd.f32 %v1026_v44, %v1018_v43 }
0x14d6   :  { %2403 = vtanh.f32 %v1028_v45 }
0x14d7   :  { %v374_v46 = vpop.permute.xlu1 %373 }
0x14d8   :  { %377 = vst.msk [vmem:[#allocation2] sm:$0xc] %vm376_vm4, %v374_v46 }
0x14db   :  { %v598_v47 = vpop.permute.xlu1 %597 }
0x14dc   :  { %601 = vst.msk [vmem:[#allocation2] sm:$0xc0] %vm600_vm5, %v598_v47 }
0x14df   :  { %v926_v48 = vpop.permute.xlu1 %925 }
0x14e0   :  { %928 = vst.msk [vmem:[#allocation2 + $0x8] sm:$0x30] %vm488_vm6, %v926_v48 }
0x14e3   :  { %v2404_v30 = vpop.eup %2403 }
0x14e4   :  { %1031 = vrot.lane.b32.xlu0 %v2404_v30, %s2540_s27 }
0x14e8   :  { %485 = vrot.lane.b32.xlu0 %v2697_v9, %s2541_s3  ;;  %v1042_v9 = vld [vmem:[#allocation5] sm:$0xff] }
0x14e9   :  { %2239 = vmatprep.subr.mxu1 %v1042_v9 }
0x14ea   :  { %2240 = vmatpush3.msra.mxu1 %v1042_v9 }
0x14eb   :  { %2255 = vmatprep.subr.mxu1 %v2538_v0 }
0x14ec   :  { %814 = vrot.lane.b32.xlu0 %v2751_v3, %s2541_s3 }
0x1556   :  { %v1032_v55 = vpop.permute.xlu0 %1031 }
0x1557   :  { %v1034_v4 = vmul.f32 %v2402_v40, %v1032_v55 }
0x1559   :  { %1036 = vrot.lane.b32.xlu0 %v1034_v4, %s2541_s3 }
0x155a   :  { %v486_v56 = vpop.permute.xlu0 %485 }
0x155b   :  { %489 = vst.msk [vmem:[#allocation2] sm:$0x30] %vm488_vm6, %v486_v56 }
0x155e   :  { %v815_v57 = vpop.permute.xlu0 %814 }
0x155f   :  { %817 = vst.msk [vmem:[#allocation2 + $0x8] sm:$0xc] %vm376_vm4, %v815_v57 }
0x1562   :  { %v1040_v7 = vld [vmem:[#allocation2] sm:$0xff] }
0x1563   :  { %2241 = vmatprep.mubr.msk.f32.mxu1 %vm164_vm3, %v1040_v7 }
0x15cb   :  { %v1037_v58 = vpop.permute.xlu0 %1036 }
0x15cc   :  { %1039 = vst.msk [vmem:[#allocation2 + $0x8] sm:$0xc0] %vm600_vm5, %v1037_v58 }
0x15d3   :  { %v1041_v59 = vld [vmem:[#allocation2 + $0x8] sm:$0xff] }
0x15d4   :  { %2242 = vmatmul.mubr.msk.f32.vlgmr.msra.gmra.mxu1 %vm164_vm3, %v1041_v59 }
0x15d5   :  { %2256 = vmatpush3.msra.mxu1 %v2780_v51  ;;  %2263 = vmatprep.mubr.msk.f32.mxu1 %vm2539_vm0, %v2538_v0 }
0x15d6   :  { %2257 = vmatprep.subr.mxu1 %v2538_v0 }
0x15d7   :  { %2258 = vmatpush3.msra.mxu1 %v2783_v52 }
0x15d8   :  { %2259 = vmatprep.subr.mxu1 %v2538_v0 }
0x15d9   :  { %2260 = vmatpush3.msra.mxu1 %v2786_v2 }
0x15da   :  { %2261 = vmatprep.subr.mxu1 %v2538_v0 }
0x15db   :  { %2262 = vmatpush3.msra.mxu1 %v2792_v54 }
0x15dc   :  { %2277 = vmatprep.subr.mxu1 %v2538_v0 }
0x1694   :  { %v2243_v62 = vpop.f32.mrf.mxu1 }
0x1695   :  { %v2827_v63 = vadd.f32 %v2243_v62, %v2030_v61 }
0x1696   :  { %v1129_v1 = vpop.f32.mrf.mxu1 }
0x1697   :  { %v2829_v3 = vadd.f32 %v2030_v61, %v1129_v1 }
0x1699   :  { %v1208_v5 = vadd.f32 %v1204_v8, %v2829_v3 }
0x169b   :  { %2405 = vtanh.f32 %v1208_v5  ;;  %v2033_v10 = vmul.f32 -1.442695, %v1208_v5 }
0x169d   :  { %2407 = vpow2.f32 %v2033_v10 }
0x16a8   :  { %v2406_v6 = vpop.eup %2405 }
0x16a9   :  { %1218 = vrot.lane.b32.xlu1 %v2406_v6, %s2540_s27 }
0x16aa   :  { %v2408_v12 = vpop.eup %2407 }
0x16ab   :  { %v1212_v14 = vadd.f32 1.0, %v2408_v12 }
0x16ad   :  { %2409 = vrcp.f32 %v1212_v14 }
0x16ba   :  { %v2410_v15 = vpop.eup %2409 }
0x16bb   :  { %v1216_v18 = vmul.f32 0.0, %v2410_v15 }
0x171b   :  { %v1219_v16 = vpop.permute.xlu1 %1218 }
0x171c   :  { %v1221_v17 = vmul.f32 %v2410_v15, %v1219_v16 }
0x171e   :  { %1223 = vrot.lane.b32.xlu0 %v1221_v17, %s2541_s3 }
0x1790   :  { %v1224_v19 = vpop.permute.xlu0 %1223 }
0x1791   :  { %v1226_v20 = vadd.f32 %v1224_v19, %v1216_v18 }
0x1793   :  { %2411 = vtanh.f32 %v1226_v20  ;;  %v1322_v36 = vrot.slane %v1226_v20, 6 }
0x17a0   :  { %v2412_v21 = vpop.eup %2411 }
0x17a1   :  { %1229 = vrot.lane.b32.xlu1 %v2412_v21, %s2540_s27 }
0x1813   :  { %v1230_v22 = vpop.permute.xlu1 %1229 }
0x1814   :  { %v1232_v23 = vmul.f32 %v2410_v15, %v1230_v22 }
0x1816   :  { %1234 = vrot.lane.b32.xlu0 %v1232_v23, %s2541_s3 }
0x1888   :  { %v1235_v24 = vpop.permute.xlu0 %1234 }
0x1889   :  { %1237 = vst.msk [vmem:[%s2986_s7] sm:$0x3] %vm267_vm2, %v1235_v24  ;;  %2264 = vmatmul.mubr.msk.f32.vlgmr.msra.gmra.mxu1 %vm164_vm3, %v1235_v24 }
0x188a   :  { %2278 = vmatpush3.msra.mxu1 %v2780_v51  ;;  %2285 = vmatprep.mubr.msk.f32.mxu1 %vm2539_vm0, %v2538_v0 }
0x188b   :  { %2279 = vmatprep.subr.mxu1 %v2538_v0 }
0x188c   :  { %2280 = vmatpush3.msra.mxu1 %v2783_v52 }
0x188d   :  { %2281 = vmatprep.subr.mxu1 %v2538_v0 }
0x188e   :  { %2282 = vmatpush3.msra.mxu1 %v2786_v2 }
0x188f   :  { %2283 = vmatprep.subr.mxu1 %v2538_v0 }
0x1890   :  { %2284 = vmatpush3.msra.mxu1 %v2792_v54 }
0x1891   :  { %2299 = vmatprep.subr.mxu1 %v2538_v0 }
0x1949   :  { %v1306_v25 = vpop.f32.mrf.mxu1 }
0x194a   :  { %v1311_v26 = vrot.slane %v1306_v25, 6 }
0x194b   :  { %v2265_v27 = vpop.f32.mrf.mxu1 }
0x194c   :  { %v1313_v28 = vadd.f32 %v1311_v26, %v2829_v3 }
0x194e   :  { %2413 = vtanh.f32 %v1313_v28  ;;  %v2035_v29 = vmul.f32 -1.442695, %v1313_v28 }
0x1950   :  { %2415 = vpow2.f32 %v2035_v29 }
0x195b   :  { %v2414_v13 = vpop.eup %2413 }
0x195c   :  { %1326 = vrot.lane.b32.xlu1 %v2414_v13, %s2540_s27 }
0x195d   :  { %v2416_v31 = vpop.eup %2415 }
0x195e   :  { %v1317_v32 = vadd.f32 1.0, %v2416_v31 }
0x1960   :  { %2417 = vrcp.f32 %v1317_v32 }
0x196d   :  { %v2418_v33 = vpop.eup %2417 }
0x196e   :  { %v1324_v37 = vmul.f32 %v2418_v33, %v1322_v36 }
0x19ce   :  { %v1327_v34 = vpop.permute.xlu1 %1326 }
0x19cf   :  { %v1329_v35 = vmul.f32 %v2418_v33, %v1327_v34 }
0x19d1   :  { %1331 = vrot.lane.b32.xlu0 %v1329_v35, %s2541_s3 }
0x1a43   :  { %v1332_v38 = vpop.permute.xlu0 %1331 }
0x1a44   :  { %v1334_v39 = vadd.f32 %v1332_v38, %v1324_v37 }
0x1a46   :  { %2419 = vtanh.f32 %v1334_v39  ;;  %v1433_v4 = vrot.slane %v1334_v39, 6 }
0x1a53   :  { %v2420_v40 = vpop.eup %2419 }
0x1a54   :  { %1337 = vrot.lane.b32.xlu1 %v2420_v40, %s2540_s27 }
0x1ac6   :  { %v1338_v41 = vpop.permute.xlu1 %1337 }
0x1ac7   :  { %v2855_v42 = vmul.f32 %v2418_v33, %v1338_v41 }
0x1ac9   :  { %v1346_v11 = vrot.slane %v2855_v42, 2 }
0x1acb   :  { %1347 = vrot.lane.b32.xlu0 %v1346_v11, %s2541_s3 }
0x1b3d   :  { %v1348_v43 = vpop.permute.xlu0 %1347 }
0x1b3e   :  { %2275 = vmatmul.mubr.msk.f32.vlgmr.msra.gmra.mxu0 %vm164_vm3, %v1348_v43 }
0x1b3f   :  { %2289 = vmatpush3.msra.mxu0 %v2780_v51  ;;  %2296 = vmatprep.mubr.msk.f32.mxu0 %vm2539_vm0, %v2538_v0 }
0x1b40   :  { %2290 = vmatprep.subr.mxu0 %v2538_v0 }
0x1b41   :  { %2291 = vmatpush3.msra.mxu0 %v2783_v52 }
0x1b42   :  { %2292 = vmatprep.subr.mxu0 %v2538_v0 }
0x1b43   :  { %2293 = vmatpush3.msra.mxu0 %v2786_v2 }
0x1b44   :  { %2294 = vmatprep.subr.mxu0 %v2538_v0 }
0x1b45   :  { %2295 = vmatpush3.msra.mxu0 %v2792_v54 }
0x1b46   :  { %2310 = vmatprep.subr.mxu0 %v2538_v0 }
0x1bfe   :  { %v1417_v44 = vpop.f32.mrf.mxu0 }
0x1bff   :  { %v1422_v45 = vrot.slane %v1417_v44, 4 }
0x1c00   :  { %v2276_v46 = vpop.f32.mrf.mxu0 }
0x1c01   :  { %v1424_v47 = vadd.f32 %v1422_v45, %v2829_v3 }
0x1c03   :  { %2421 = vtanh.f32 %v1424_v47  ;;  %v2037_v30 = vmul.f32 -1.442695, %v1424_v47 }
0x1c05   :  { %2423 = vpow2.f32 %v2037_v30 }
0x1c10   :  { %v2422_v48 = vpop.eup %2421 }
0x1c11   :  { %1437 = vrot.lane.b32.xlu1 %v2422_v48, %s2540_s27 }
0x1c12   :  { %v2424_v49 = vpop.eup %2423 }
0x1c13   :  { %v1428_v50 = vadd.f32 1.0, %v2424_v49 }
0x1c15   :  { %2425 = vrcp.f32 %v1428_v50 }
0x1c22   :  { %v2426_v53 = vpop.eup %2425 }
0x1c23   :  { %v1435_v56 = vmul.f32 %v2426_v53, %v1433_v4 }
0x1c83   :  { %v1438_v9 = vpop.permute.xlu1 %1437 }
0x1c84   :  { %v1440_v55 = vmul.f32 %v2426_v53, %v1438_v9 }
0x1c86   :  { %1442 = vrot.lane.b32.xlu0 %v1440_v55, %s2541_s3 }
0x1cf8   :  { %v1443_v57 = vpop.permute.xlu0 %1442 }
0x1cf9   :  { %v1445_v7 = vadd.f32 %v1443_v57, %v1435_v56 }
0x1cfb   :  { %2427 = vtanh.f32 %v1445_v7  ;;  %v1544_v19 = vrot.slane %v1445_v7, 6 }
0x1d08   :  { %v2428_v58 = vpop.eup %2427 }
0x1d09   :  { %1448 = vrot.lane.b32.xlu1 %v2428_v58, %s2540_s27 }
0x1d7b   :  { %v1449_v59 = vpop.permute.xlu1 %1448 }
0x1d7c   :  { %v2874_v8 = vmul.f32 %v2426_v53, %v1449_v59 }
0x1d7e   :  { %v1457_v60 = vrot.slane %v2874_v8, 4 }
0x1d80   :  { %1458 = vrot.lane.b32.xlu0 %v1457_v60, %s2541_s3 }
0x1df2   :  { %v1459_v61 = vpop.permute.xlu0 %1458 }
0x1df3   :  { %2286 = vmatmul.mubr.msk.f32.vlgmr.msra.gmra.mxu1 %vm164_vm3, %v1459_v61 }
0x1df4   :  { %2300 = vmatpush3.msra.mxu1 %v2780_v51  ;;  %2307 = vmatprep.mubr.msk.f32.mxu1 %vm2539_vm0, %v2538_v0 }
0x1df5   :  { %2301 = vmatprep.subr.mxu1 %v2538_v0 }
0x1df6   :  { %2302 = vmatpush3.msra.mxu1 %v2783_v52 }
0x1df7   :  { %2303 = vmatprep.subr.mxu1 %v2538_v0 }
0x1df8   :  { %2304 = vmatpush3.msra.mxu1 %v2786_v2 }
0x1df9   :  { %2305 = vmatprep.subr.mxu1 %v2538_v0 }
0x1dfa   :  { %2306 = vmatpush3.msra.mxu1 %v2792_v54 }
0x1dfb   :  { %2321 = vmatprep.subr.mxu1 %v2538_v0 }
0x1eb3   :  { %v1528_v62 = vpop.f32.mrf.mxu1 }
0x1eb4   :  { %v1533_v1 = vrot.slane %v1528_v62, 2 }
0x1eb5   :  { %v2287_v5 = vpop.f32.mrf.mxu1 }
0x1eb6   :  { %v1535_v6 = vadd.f32 %v1533_v1, %v2829_v3 }
0x1eb8   :  { %2429 = vtanh.f32 %v1535_v6  ;;  %v2039_v12 = vmul.f32 -1.442695, %v1535_v6 }
0x1eba   :  { %2431 = vpow2.f32 %v2039_v12 }
0x1ec5   :  { %v2430_v10 = vpop.eup %2429 }
0x1ec6   :  { %1548 = vrot.lane.b32.xlu1 %v2430_v10, %s2540_s27 }
0x1ec7   :  { %v2432_v14 = vpop.eup %2431 }
0x1ec8   :  { %v1539_v15 = vadd.f32 1.0, %v2432_v14 }
0x1eca   :  { %2433 = vrcp.f32 %v1539_v15 }
0x1ed7   :  { %v2434_v16 = vpop.eup %2433 }
0x1ed8   :  { %v1546_v20 = vmul.f32 %v2434_v16, %v1544_v19 }
0x1f38   :  { %v1549_v17 = vpop.permute.xlu1 %1548 }
0x1f39   :  { %v1551_v18 = vmul.f32 %v2434_v16, %v1549_v17 }
0x1f3b   :  { %1553 = vrot.lane.b32.xlu0 %v1551_v18, %s2541_s3 }
0x1fad   :  { %v1554_v21 = vpop.permute.xlu0 %1553 }
0x1fae   :  { %v1556_v22 = vadd.f32 %v1554_v21, %v1546_v20 }
0x1fb0   :  { %2435 = vtanh.f32 %v1556_v22  ;;  %v1652_v37 = vrot.slane %v1556_v22, 6 }
0x1fbd   :  { %v2436_v3 = vpop.eup %2435 }
0x1fbe   :  { %1559 = vrot.lane.b32.xlu1 %v2436_v3, %s2540_s27 }
0x2030   :  { %v1560_v23 = vpop.permute.xlu1 %1559 }
0x2031   :  { %v2893_v24 = vmul.f32 %v2434_v16, %v1560_v23 }
0x2033   :  { %v1568_v25 = vrot.slane %v2893_v24, 6 }
0x2035   :  { %1569 = vrot.lane.b32.xlu0 %v1568_v25, %s2541_s3 }
0x20a7   :  { %v1570_v26 = vpop.permute.xlu0 %1569 }
0x20a8   :  { %2297 = vmatmul.mubr.msk.f32.vlgmr.msra.gmra.mxu0 %vm164_vm3, %v1570_v26 }
0x20a9   :  { %2311 = vmatpush3.msra.mxu0 %v2780_v51  ;;  %2318 = vmatprep.mubr.msk.f32.mxu0 %vm2539_vm0, %v2538_v0 }
0x20aa   :  { %2312 = vmatprep.subr.mxu0 %v2538_v0 }
0x20ab   :  { %2313 = vmatpush3.msra.mxu0 %v2783_v52 }
0x20ac   :  { %2314 = vmatprep.subr.mxu0 %v2538_v0 }
0x20ad   :  { %2315 = vmatpush3.msra.mxu0 %v2786_v2 }
0x20ae   :  { %2316 = vmatprep.subr.mxu0 %v2538_v0 }
0x20af   :  { %2317 = vmatpush3.msra.mxu0 %v2792_v54 }
0x2168   :  { %v1639_v27 = vpop.f32.mrf.mxu0 }
0x2169   :  { %v1643_v28 = vadd.f32 %v1639_v27, %v2827_v63 }
0x216a   :  { %v2298_v13 = vpop.f32.mrf.mxu0 }
0x216b   :  { %2437 = vtanh.f32 %v1643_v28  ;;  %v2041_v31 = vmul.f32 -1.442695, %v1643_v28 }
0x216d   :  { %2439 = vpow2.f32 %v2041_v31 }
0x2178   :  { %v2438_v29 = vpop.eup %2437 }
0x2179   :  { %1656 = vrot.lane.b32.xlu1 %v2438_v29, %s2540_s27 }
0x217a   :  { %v2440_v32 = vpop.eup %2439 }
0x217b   :  { %v1647_v33 = vadd.f32 1.0, %v2440_v32 }
0x217d   :  { %2441 = vrcp.f32 %v1647_v33 }
0x218a   :  { %v2442_v34 = vpop.eup %2441 }
0x218b   :  { %v1654_v38 = vmul.f32 %v2442_v34, %v1652_v37 }
0x21eb   :  { %v1657_v35 = vpop.permute.xlu1 %1656 }
0x21ec   :  { %v1659_v36 = vmul.f32 %v2442_v34, %v1657_v35 }
0x21ee   :  { %1661 = vrot.lane.b32.xlu0 %v1659_v36, %s2541_s3 }
0x2260   :  { %v1662_v39 = vpop.permute.xlu0 %1661 }
0x2261   :  { %v1664_v40 = vadd.f32 %v1662_v39, %v1654_v38 }
0x2263   :  { %2443 = vtanh.f32 %v1664_v40 }
0x2270   :  { %v2444_v41 = vpop.eup %2443 }
0x2271   :  { %1667 = vrot.lane.b32.xlu1 %v2444_v41, %s2540_s27 }
0x22e3   :  { %v1668_v11 = vpop.permute.xlu1 %1667 }
0x22e4   :  { %v1670_v43 = vmul.f32 %v2442_v34, %v1668_v11 }
0x22e6   :  { %1672 = vrot.lane.b32.xlu0 %v1670_v43, %s2541_s3 }
0x2358   :  { %v1673_v44 = vpop.permute.xlu0 %1672 }
0x2359   :  { %1675 = vst.msk [vmem:[%s2986_s7 + $0x8] sm:$0x3] %vm267_vm2, %v1673_v44  ;;  %2308 = vmatmul.mubr.msk.f32.vlgmr.msra.gmra.mxu1 %vm164_vm3, %v1673_v44 }
0x235a   :  { %2322 = vmatpush3.msra.mxu1 %v2780_v51  ;;  %2329 = vmatprep.mubr.msk.f32.mxu1 %vm2539_vm0, %v2538_v0 }
0x235b   :  { %2323 = vmatprep.subr.mxu1 %v2538_v0 }
0x235c   :  { %2324 = vmatpush3.msra.mxu1 %v2783_v52 }
0x235d   :  { %2325 = vmatprep.subr.mxu1 %v2538_v0 }
0x235e   :  { %2326 = vmatpush3.msra.mxu1 %v2786_v2 }
0x235f   :  { %2327 = vmatprep.subr.mxu1 %v2538_v0  ;;  %v1760_v0 = vrot.slane %v1664_v40, 6 }
0x2360   :  { %2328 = vmatpush3.msra.mxu1 %v2792_v54 }
0x2419   :  { %v1744_v45 = vpop.f32.mrf.mxu1 }
0x241a   :  { %v1749_v46 = vrot.slane %v1744_v45, 6 }
0x241b   :  { %v2309_v47 = vpop.f32.mrf.mxu1 }
0x241c   :  { %v1751_v51 = vadd.f32 %v1749_v46, %v2827_v63 }
0x241e   :  { %2445 = vtanh.f32 %v1751_v51  ;;  %v2043_v30 = vmul.f32 -1.442695, %v1751_v51 }
0x2420   :  { %2447 = vpow2.f32 %v2043_v30 }
0x242b   :  { %v2446_v48 = vpop.eup %2445 }
0x242c   :  { %1764 = vrot.lane.b32.xlu1 %v2446_v48, %s2540_s27 }
0x242d   :  { %v2448_v52 = vpop.eup %2447 }
0x242e   :  { %v1755_v49 = vadd.f32 1.0, %v2448_v52 }
0x2430   :  { %2449 = vrcp.f32 %v1755_v49 }
0x243d   :  { %v2450_v50 = vpop.eup %2449 }
0x243e   :  { %v1762_v54 = vmul.f32 %v2450_v50, %v1760_v0 }
0x249e   :  { %v1765_v2 = vpop.permute.xlu1 %1764 }
0x249f   :  { %v1767_v53 = vmul.f32 %v2450_v50, %v1765_v2 }
0x24a1   :  { %1769 = vrot.lane.b32.xlu0 %v1767_v53, %s2541_s3 }
0x2513   :  { %v1770_v9 = vpop.permute.xlu0 %1769 }
0x2514   :  { %v1772_v55 = vadd.f32 %v1770_v9, %v1762_v54 }
0x2516   :  { %2451 = vtanh.f32 %v1772_v55  ;;  %v1871_v16 = vrot.slane %v1772_v55, 6 }
0x2523   :  { %v2452_v4 = vpop.eup %2451 }
0x2524   :  { %1775 = vrot.lane.b32.xlu1 %v2452_v4, %s2540_s27 }
0x2596   :  { %v1776_v56 = vpop.permute.xlu1 %1775 }
0x2597   :  { %v2930_v57 = vmul.f32 %v2450_v50, %v1776_v56 }
0x2599   :  { %v1784_v7 = vrot.slane %v2930_v57, 2 }
0x259b   :  { %1785 = vrot.lane.b32.xlu0 %v1784_v7, %s2541_s3 }
0x260d   :  { %v1786_v58 = vpop.permute.xlu0 %1785 }
0x260e   :  { %2319 = vmatmul.mubr.msk.f32.vlgmr.msra.gmra.mxu0 %vm164_vm3, %v1786_v58 }
0x26ce   :  { %v1855_v59 = vpop.f32.mrf.mxu0 }
0x26cf   :  { %v1860_v60 = vrot.slane %v1855_v59, 4 }
0x26d0   :  { %v2320_v61 = vpop.f32.mrf.mxu0 }
0x26d1   :  { %v1862_v62 = vadd.f32 %v1860_v60, %v2827_v63 }
0x26d3   :  { %2453 = vtanh.f32 %v1862_v62  ;;  %v2045_v5 = vmul.f32 -1.442695, %v1862_v62 }
0x26d5   :  { %2455 = vpow2.f32 %v2045_v5 }
0x26e0   :  { %v2454_v1 = vpop.eup %2453 }
0x26e1   :  { %1875 = vrot.lane.b32.xlu1 %v2454_v1, %s2540_s27 }
0x26e2   :  { %v2456_v6 = vpop.eup %2455 }
0x26e3   :  { %v1866_v10 = vadd.f32 1.0, %v2456_v6 }
0x26e5   :  { %2457 = vrcp.f32 %v1866_v10 }
0x26f2   :  { %v2458_v12 = vpop.eup %2457 }
0x26f3   :  { %v1873_v17 = vmul.f32 %v2458_v12, %v1871_v16 }
0x2753   :  { %v1876_v14 = vpop.permute.xlu1 %1875 }
0x2754   :  { %v1878_v15 = vmul.f32 %v2458_v12, %v1876_v14 }
0x2756   :  { %1880 = vrot.lane.b32.xlu0 %v1878_v15, %s2541_s3 }
0x27c8   :  { %v1881_v18 = vpop.permute.xlu0 %1880 }
0x27c9   :  { %v1883_v19 = vadd.f32 %v1881_v18, %v1873_v17 }
0x27cb   :  { %2459 = vtanh.f32 %v1883_v19 }
0x27d8   :  { %v2460_v20 = vpop.eup %2459 }
0x27d9   :  { %1886 = vrot.lane.b32.xlu1 %v2460_v20, %s2540_s27 }
0x284b   :  { %v1887_v21 = vpop.permute.xlu1 %1886 }
0x284c   :  { %v1889_v22 = vmul.f32 %v2458_v12, %v1887_v21 }
0x284e   :  { %v1895_v3 = vrot.slane %v1889_v22, 4 }
0x2850   :  { %1896 = vrot.lane.b32.xlu0 %v1895_v3, %s2541_s3 }
0x28c2   :  { %v1897_v23 = vpop.permute.xlu0 %1896 }
0x28c3   :  { %2330 = vmatmul.mubr.msk.f32.vlgmr.msra.gmra.mxu1 %vm164_vm3, %v1897_v23 }
0x2983   :  { %v1966_v25 = vpop.f32.mrf.mxu1 }
0x2984   :  { %v1971_v26 = vrot.slane %v1966_v25, 2 }
0x2985   :  { %v2331_v27 = vpop.f32.mrf.mxu1 }
0x2986   :  { %v1973_v28 = vadd.f32 %v1971_v26, %v2827_v63  ;;  %v1982_v63 = vrot.slane %v1883_v19, 6 }
0x2988   :  { %2461 = vtanh.f32 %v1973_v28  ;;  %v2047_v29 = vmul.f32 -1.442695, %v1973_v28 }
0x298a   :  { %2463 = vpow2.f32 %v2047_v29 }
0x2995   :  { %v2462_v13 = vpop.eup %2461 }
0x2996   :  { %1986 = vrot.lane.b32.xlu1 %v2462_v13, %s2540_s27 }
0x2997   :  { %v2464_v31 = vpop.eup %2463 }
0x2998   :  { %v1977_v32 = vadd.f32 1.0, %v2464_v31 }
0x299a   :  { %2465 = vrcp.f32 %v1977_v32 }
0x29a7   :  { %v2466_v33 = vpop.eup %2465 }
0x29a8   :  { %v1984_v36 = vmul.f32 %v2466_v33, %v1982_v63 }
0x2a08   :  { %v1987_v34 = vpop.permute.xlu1 %1986 }
0x2a09   :  { %v1989_v35 = vmul.f32 %v2466_v33, %v1987_v34 }
0x2a0b   :  { %1991 = vrot.lane.b32.xlu0 %v1989_v35, %s2541_s3 }
0x2a0f   :  { %1342 = vrot.lane.b32.xlu0 %v2855_v42, %s2541_s3 }
0x2a13   :  { %1564 = vrot.lane.b32.xlu0 %v2893_v24, %s2541_s3 }
0x2a17   :  { %1891 = vrot.lane.b32.xlu0 %v1889_v22, %s2541_s3 }
0x2a7d   :  { %v1992_v37 = vpop.permute.xlu0 %1991 }
0x2a7e   :  { %v1994_v38 = vadd.f32 %v1992_v37, %v1984_v36 }
0x2a80   :  { %2467 = vtanh.f32 %v1994_v38 }
0x2a81   :  { %v1343_v39 = vpop.permute.xlu0 %1342 }
0x2a82   :  { %1345 = vst.msk [vmem:[%s2986_s7] sm:$0xc] %vm376_vm4, %v1343_v39 }
0x2a85   :  { %v1565_v40 = vpop.permute.xlu0 %1564 }
0x2a86   :  { %1567 = vst.msk [vmem:[%s2986_s7] sm:$0xc0] %vm600_vm5, %v1565_v40 }
0x2a89   :  { %v1892_v42 = vpop.permute.xlu0 %1891 }
0x2a8a   :  { %1894 = vst.msk [vmem:[%s2986_s7 + $0x8] sm:$0x30] %vm488_vm6, %v1892_v42 }
0x2a8d   :  { %v2468_v24 = vpop.eup %2467 }
0x2a8e   :  { %1997 = vrot.lane.b32.xlu1 %v2468_v24, %s2540_s27 }
0x2a92   :  { %1453 = vrot.lane.b32.xlu1 %v2874_v8, %s2541_s3 }
0x2a96   :  { %1780 = vrot.lane.b32.xlu1 %v2930_v57, %s2541_s3 }
0x2b00   :  { %v1998_v41 = vpop.permute.xlu1 %1997 }
0x2b01   :  { %v2000_v11 = vmul.f32 %v2466_v33, %v1998_v41 }
0x2b03   :  { %2002 = vrot.lane.b32.xlu1 %v2000_v11, %s2541_s3 }
0x2b04   :  { %v1454_v43 = vpop.permute.xlu1 %1453 }
0x2b05   :  { %1456 = vst.msk [vmem:[%s2986_s7] sm:$0x30] %vm488_vm6, %v1454_v43 }
0x2b08   :  { %v1781_v44 = vpop.permute.xlu1 %1780 }
0x2b09   :  { %1783 = vst.msk [vmem:[%s2986_s7 + $0x8] sm:$0xc] %vm376_vm4, %v1781_v44 }
0x2b75   :  { %v2003_v8 = vpop.permute.xlu1 %2002 }
0x2b76   :  { %2005 = vst.msk [vmem:[%s2986_s7 + $0x8] sm:$0xc0] %vm600_vm5, %v2003_v8 }
0x2b77   :  { %2010 = vsyncpa [#allocation4], 1 }
0x2b78   :  { %2011 = vsyncpa [#allocation6], 1 }

</bundles_post_ra>
